<compile_context>
chip_gen: v6e
topology: v6e:2x2x1
jax: 0.10.0
libtpu: 0.0.40
codegen_flags: <defaults>
</compile_context>

<pallas_src>
import functools
import math

import jax
import jax.numpy as jnp
from jax.experimental import pallas as pl
from jax.experimental.pallas import tpu as pltpu


# ----------------------------------------------------------------------------
# Helpers
# ----------------------------------------------------------------------------
def _full_spec(shape):
    """Whole-array block for a grid=(1,) pallas_call."""
    nd = len(shape)
    return pl.BlockSpec(shape, lambda i, _nd=nd: (0,) * _nd)


def _choose_tile(n, max_tile=2048):
    """Largest 128-multiple divisor of n that is <= max_tile (falls back to n)."""
    if n % 128 != 0:
        return n
    t = min(n, max_tile)
    while n % t != 0:
        t -= 128
    return t


# ----------------------------------------------------------------------------
# Pallas kernels
# ----------------------------------------------------------------------------
def _patch_embed_kernel(p_ref, w_ref, b_ref, cls_ref, pos_ref, o_ref, *,
                        batch, n_patches):
    """Patch projection + conv bias + cls token + positional embedding, fused.

    p_ref:   (B*NP, PD)   flattened patches
    w_ref:   (PD, E), b_ref: (1, E)
    cls_ref: (1, E), pos_ref: (NP+1, E)
    o_ref:   (B*(NP+1), E) tokens, rows ordered (b, token)
    """
    NP = n_patches
    P = NP + 1
    emb = jnp.dot(p_ref[...], w_ref[...],
                  preferred_element_type=jnp.float32) + b_ref[...]   # (B*NP, E)
    pos = pos_ref[...]
    cls_row = cls_ref[...] + pos[0:1, :]                             # (1, E)
    body_pos = pos[1:, :]                                            # (NP, E)
    for b in range(batch):
        o_ref[b * P:b * P + 1, :] = cls_row
        o_ref[b * P + 1:(b + 1) * P, :] = emb[b * NP:(b + 1) * NP, :] + body_pos


def _encoder_stack_kernel(x_ref, wq_ref, bq_ref, wk_ref, bk_ref, wv_ref, bv_ref,
                          wo_ref, bo_ref, ln1g_ref, ln1b_ref,
                          w1_ref, b1_ref, w2_ref, b2_ref, ln2g_ref, ln2b_ref,
                          o_ref, state, attn_scr, *, seq_len, num_heads):
    """Whole encoder stack: one grid step == one fused nn.TransformerEncoderLayer
    (post-LN, ReLU, dropout=identity).  Token state lives in VMEM scratch across
    grid steps; per-layer weights are streamed in via the (depth,) grid axis.

    x_ref / o_ref / state: (M, E) with M = L*N, rows ordered (l, n), where
    L = seq_len (= batch, per the batch_first=False quirk) and N = tokens.
    """
    layer = pl.program_id(0)

    @pl.when(layer == 0)
    def _():
        state[...] = x_ref[...]

    M, E = state.shape
    L = seq_len
    N = M // L
    H = num_heads
    Dh = E // H
    scale = 1.0 / math.sqrt(Dh)

    x = state[...]

    # Per-layer weights (leading depth axis squeezed by indexing the size-1 dim).
    wq = wq_ref[0]; bq = bq_ref[0]
    wk = wk_ref[0]; bk = bk_ref[0]
    wv = wv_ref[0]; bv = bv_ref[0]
    wo = wo_ref[0]; bo = bo_ref[0]
    ln1g = ln1g_ref[0]; ln1b = ln1b_ref[0]
    w1 = w1_ref[0]; b1 = b1_ref[0]
    w2 = w2_ref[0]; b2 = b2_ref[0]
    ln2g = ln2g_ref[0]; ln2b = ln2b_ref[0]

    # QKV projections (q pre-scaled; identical math to scaling the scores).
    q = (jnp.dot(x, wq, preferred_element_type=jnp.float32) + bq) * scale
    k = jnp.dot(x, wk, preferred_element_type=jnp.float32) + bk
    v = jnp.dot(x, wv, preferred_element_type=jnp.float32) + bv

    # Constant block-diagonal matrices: hsum reduces the E lanes per head,
    # hexp replicates a per-head value across its Dh lanes.  Built from iota so
    # no reshapes/transposes are needed inside the kernel.
    e_col = jax.lax.broadcasted_iota(jnp.int32, (E, H), 0)
    h_col = jax.lax.broadcasted_iota(jnp.int32, (E, H), 1)
    hsum = jnp.where((e_col >= h_col * Dh) & (e_col < (h_col + 1) * Dh),
                     1.0, 0.0).astype(jnp.float32)                   # (E, H)
    h_row = jax.lax.broadcasted_iota(jnp.int32, (H, E), 0)
    e_row = jax.lax.broadcasted_iota(jnp.int32, (H, E), 1)
    hexp = jnp.where((e_row >= h_row * Dh) & (e_row < (h_row + 1) * Dh),
                     1.0, 0.0).astype(jnp.float32)                   # (H, E)

    # Multi-head self-attention over dim0 (L = batch), all tokens/heads at once.
    # L is tiny, so the L x L score structure is unrolled statically.
    for l in range(L):
        ql = q[l * N:(l + 1) * N, :]                                 # (N, E)
        scores = []
        for m in range(L):
            km = k[m * N:(m + 1) * N, :]
            scores.append(jnp.dot(ql * km, hsum,
                                  preferred_element_type=jnp.float32))  # (N, H)
        mx = scores[0]
        for m in range(1, L):
            mx = jnp.maximum(mx, scores[m])
        expo = [jnp.exp(s - mx) for s in scores]
        den = expo[0]
        for m in range(1, L):
            den = den + expo[m]
        inv = 1.0 / den                                              # (N, H)
        acc = jnp.zeros((N, E), jnp.float32)
        for m in range(L):
            p_full = jnp.dot(expo[m] * inv, hexp,
                             preferred_element_type=jnp.float32)     # (N, E)
            acc = acc + p_full * v[m * N:(m + 1) * N, :]
        attn_scr[l * N:(l + 1) * N, :] = acc

    attn = jnp.dot(attn_scr[...], wo, preferred_element_type=jnp.float32) + bo

    # Residual + LayerNorm 1 (eps matches nn.LayerNorm default).
    h1 = x + attn
    mu1 = jnp.mean(h1, axis=-1, keepdims=True)
    var1 = jnp.mean((h1 - mu1) ** 2, axis=-1, keepdims=True)
    y1 = (h1 - mu1) * jax.lax.rsqrt(var1 + 1e-5) * ln1g + ln1b

    # Feed-forward (ReLU) + residual + LayerNorm 2.
    ff = jnp.maximum(jnp.dot(y1, w1, preferred_element_type=jnp.float32) + b1, 0.0)
    ff = jnp.dot(ff, w2, preferred_element_type=jnp.float32) + b2
    h2 = y1 + ff
    mu2 = jnp.mean(h2, axis=-1, keepdims=True)
    var2 = jnp.mean((h2 - mu2) ** 2, axis=-1, keepdims=True)
    state[...] = (h2 - mu2) * jax.lax.rsqrt(var2 + 1e-5) * ln2g + ln2b

    @pl.when(layer == pl.num_programs(0) - 1)
    def _():
        o_ref[...] = state[...]


def _head_mlp_kernel(x_ref, g_ref, b_ref, w_ref, bias_ref, o_ref):
    """Fused head LayerNorm + first Linear(E, E)."""
    x = x_ref[...]
    mu = jnp.mean(x, axis=-1, keepdims=True)
    var = jnp.mean((x - mu) ** 2, axis=-1, keepdims=True)
    y = (x - mu) * jax.lax.rsqrt(var + 1e-5) * g_ref[...] + b_ref[...]
    o_ref[...] = jnp.dot(y, w_ref[...],
                         preferred_element_type=jnp.float32) + bias_ref[...]


def _tiled_linear_kernel(x_ref, w_ref, b_ref, o_ref):
    """One lane-dense output tile of the big head projection."""
    o_ref[...] = (jnp.dot(x_ref[...], w_ref[...],
                          preferred_element_type=jnp.float32) + b_ref[...])


# ----------------------------------------------------------------------------
# Wrappers
# ----------------------------------------------------------------------------
def patch_embed(x, p, *, patch_size):
    # x: NCHW (B, C=1, H, W).  Conv2d(k=ps, stride=ps) == patchify + matmul.
    B, C, Hh, Ww = x.shape
    ps = patch_size
    Hp, Wp = Hh // ps, Ww // ps
    NP = Hp * Wp
    PD = C * ps * ps
    P = NP + 1
    # (c, ki, kj) ordering matches flattening of the Conv2d weight (E, C, ps, ps).
    patches = (x.reshape(B, C, Hp, ps, Wp, ps)
                .transpose(0, 2, 4, 1, 3, 5)
                .reshape(B * NP, PD))
    E = p["proj_w"].shape[1]
    kernel = functools.partial(_patch_embed_kernel, batch=B, n_patches=NP)
    args = (patches, p["proj_w"], p["proj_b"], p["cls_token"], p["pos_embed"])
    return pl.pallas_call(
        kernel,
        grid=(1,),
        in_specs=[_full_spec(a.shape) for a in args],
        out_specs=_full_spec((B * P, E)),
        out_shape=jax.ShapeDtypeStruct((B * P, E), jnp.float32),
    )(*args)                                                   # (B*P, E)


def encoder_stack(tok, lp, *, seq_len, num_heads):
    M, E = tok.shape
    depth = lp["wq"].shape[0]
    mlp = lp["w1"].shape[-1]

    def wmap(l):                 # per-layer weight / bias block along depth axis
        return (l, 0, 0)

    in_specs = [
        pl.BlockSpec((M, E), lambda l: (0, 0)),     # tokens (read at layer 0)
        pl.BlockSpec((1, E, E), wmap),              # wq
        pl.BlockSpec((1, 1, E), wmap),              # bq
        pl.BlockSpec((1, E, E), wmap),              # wk
        pl.BlockSpec((1, 1, E), wmap),              # bk
        pl.BlockSpec((1, E, E), wmap),              # wv
        pl.BlockSpec((1, 1, E), wmap),              # bv
        pl.BlockSpec((1, E, E), wmap),              # wo
        pl.BlockSpec((1, 1, E), wmap),              # bo
        pl.BlockSpec((1, 1, E), wmap),              # ln1_g
        pl.BlockSpec((1, 1, E), wmap),              # ln1_b
        pl.BlockSpec((1, E, mlp), wmap),            # w1
        pl.BlockSpec((1, 1, mlp), wmap),            # b1
        pl.BlockSpec((1, mlp, E), wmap),            # w2
        pl.BlockSpec((1, 1, E), wmap),              # b2
        pl.BlockSpec((1, 1, E), wmap),              # ln2_g
        pl.BlockSpec((1, 1, E), wmap),              # ln2_b
    ]
    kernel = functools.partial(_encoder_stack_kernel,
                               seq_len=seq_len, num_heads=num_heads)
    args = (tok, lp["wq"], lp["bq"], lp["wk"], lp["bk"], lp["wv"], lp["bv"],
            lp["wo"], lp["bo"], lp["ln1_g"], lp["ln1_b"],
            lp["w1"], lp["b1"], lp["w2"], lp["b2"], lp["ln2_g"], lp["ln2_b"])
    return pl.pallas_call(
        kernel,
        grid=(depth,),
        in_specs=in_specs,
        out_specs=pl.BlockSpec((M, E), lambda l: (0, 0)),
        out_shape=jax.ShapeDtypeStruct((M, E), jnp.float32),
        scratch_shapes=[pltpu.VMEM((M, E), jnp.float32),    # resident token state
                        pltpu.VMEM((M, E), jnp.float32)],   # attention scratch
        compiler_params=pltpu.CompilerParams(
            dimension_semantics=("arbitrary",)),
    )(*args)


def head_mlp1(cls_tok, params):
    B, E = cls_tok.shape
    args = (cls_tok, params["head_ln_g"], params["head_ln_b"],
            params["head_w1"], params["head_b1"])
    return pl.pallas_call(
        _head_mlp_kernel,
        grid=(1,),
        in_specs=[_full_spec(a.shape) for a in args],
        out_specs=_full_spec((B, E)),
        out_shape=jax.ShapeDtypeStruct((B, E), jnp.float32),
    )(*args)


def tiled_linear(x, w, b2d, *, max_tile=2048):
    # Tiled over the (large) output dim so the weight DMA pipelines behind the
    # MXU and the HBM stores are lane-dense (tile is a multiple of 128).
    M, K = x.shape
    N = w.shape[1]
    tile = _choose_tile(N, max_tile)
    return pl.pallas_call(
        _tiled_linear_kernel,
        grid=(N // tile,),
        in_specs=[pl.BlockSpec((M, K), lambda j: (0, 0)),
                  pl.BlockSpec((K, tile), lambda j: (0, j)),
                  pl.BlockSpec((1, tile), lambda j: (0, j))],
        out_specs=pl.BlockSpec((M, tile), lambda j: (0, j)),
        out_shape=jax.ShapeDtypeStruct((M, N), jnp.float32),
        compiler_params=pltpu.CompilerParams(dimension_semantics=("parallel",)),
    )(x, w, b2d)


# ----------------------------------------------------------------------------
# Forward pass
# ----------------------------------------------------------------------------
def temporal_vit_forward(x, params, *, patch_size, num_heads, img_size):
    B = x.shape[0]
    tok = patch_embed(x, params["patch"], patch_size=patch_size)     # (B*P, E)
    E = tok.shape[-1]
    P = tok.shape[0] // B
    tok = encoder_stack(tok, params["layers"], seq_len=B, num_heads=num_heads)
    cls = tok.reshape(B, P, E)[:, 0, :]                              # (B, E)
    h = head_mlp1(cls, params)                                       # (B, E)
    # TODO(synk): exact erf-GELU (PyTorch nn.GELU default) applied in plain JAX
    # on the tiny (B, E) tensor; Mosaic erf lowering is not relied upon in-kernel.
    h = jax.nn.gelu(h, approximate=False)
    out = tiled_linear(h, params["head_w2"], params["head_b2"])      # (B, img*img)
    # Reference module hardcodes view(B, 1, 256, 256) because img_size == 256.
    return out.reshape(B, 1, img_size, img_size)


# ----------------------------------------------------------------------------
# Deterministic synthetic parameter initialization (per-layer params stacked
# along a leading depth axis so the whole stack streams through one kernel).
# ----------------------------------------------------------------------------
def init_params(key, *, img_size, patch_size, emb, num_heads, depth, mlp_dim):
    n_patches = (img_size // patch_size) ** 2
    patch_dim = patch_size * patch_size           # in_channels = 1
    keys = iter(jax.random.split(key, 64))

    def nrm(shape, scale=0.02):
        return scale * jax.random.normal(next(keys), shape, dtype=jnp.float32)

    params = {
        "patch": {
            "proj_w": nrm((patch_dim, emb)),
            "proj_b": nrm((1, emb)),
            "cls_token": nrm((1, emb)),
            "pos_embed": nrm((n_patches + 1, emb)),
        },
        # q/k/v stored separately (equivalent re-parameterization of the packed
        # PyTorch in_proj; q,k,v ordering preserved).
        "layers": {
            "wq": nrm((depth, emb, emb)), "bq": nrm((depth, 1, emb)),
            "wk": nrm((depth, emb, emb)), "bk": nrm((depth, 1, emb)),
            "wv": nrm((depth, emb, emb)), "bv": nrm((depth, 1, emb)),
            "wo": nrm((depth, emb, emb)), "bo": nrm((depth, 1, emb)),
            "ln1_g": jnp.ones((depth, 1, emb), jnp.float32),
            "ln1_b": jnp.zeros((depth, 1, emb), jnp.float32),
            "w1": nrm((depth, emb, mlp_dim)), "b1": nrm((depth, 1, mlp_dim)),
            "w2": nrm((depth, mlp_dim, emb)), "b2": nrm((depth, 1, emb)),
            "ln2_g": jnp.ones((depth, 1, emb), jnp.float32),
            "ln2_b": jnp.zeros((depth, 1, emb), jnp.float32),
        },
        "head_ln_g": jnp.ones((1, emb), jnp.float32),
        "head_ln_b": jnp.zeros((1, emb), jnp.float32),
        "head_w1": nrm((emb, emb)),
        "head_b1": nrm((1, emb)),
        "head_w2": nrm((emb, img_size * img_size)),
        "head_b2": nrm((1, img_size * img_size)),
    }
    return params


# ----------------------------------------------------------------------------
if __name__ == "__main__":
    # Small shapes consistent with the module: img 16, patch 4 -> 16 patches (+1 cls).
    IMG, PATCH, EMB, HEADS, DEPTH, MLP = 16, 4, 32, 4, 2, 64
    B = 2

    key = jax.random.PRNGKey(0)
    k_x, k_p = jax.random.split(key)
    x = jax.random.normal(k_x, (B, 1, IMG, IMG), dtype=jnp.float32)  # NCHW, like PyTorch
    params = init_params(k_p, img_size=IMG, patch_size=PATCH, emb=EMB,
                         num_heads=HEADS, depth=DEPTH, mlp_dim=MLP)

    fwd = jax.jit(functools.partial(temporal_vit_forward,
                                    patch_size=PATCH, num_heads=HEADS, img_size=IMG))
    out = jax.block_until_ready(fwd(x, params))
    assert out.shape == (B, 1, IMG, IMG), out.shape
    assert bool(jnp.all(jnp.isfinite(out)))
    print("KERNEL_OK")
</pallas_src>

<mosaic_0001>
module attributes {stable_mosaic.version = 11 : i64} {
  func.func @_patch_embed_kernel(%arg0: i32, %arg1: memref<32x16xf32, #tpu.memory_space<vmem>>, %arg2: memref<16x32xf32, #tpu.memory_space<vmem>>, %arg3: memref<1x32xf32, #tpu.memory_space<vmem>>, %arg4: memref<1x32xf32, #tpu.memory_space<vmem>>, %arg5: memref<17x32xf32, #tpu.memory_space<vmem>>, %arg6: memref<34x32xf32, #tpu.memory_space<vmem>>) attributes {dimension_semantics = [#tpu.dimension_semantics<arbitrary>], iteration_bounds = array<i64: 1>, scalar_prefetch = 0 : i64, scratch_operands = 0 : i64, tpu.core_type = #tpu.core_type<tc>, window_params = [{pipeline_mode = #tpu.pipeline_mode<synchronous>, transform_indices = @transform_0, window_bounds = array<i64: 32, 16>}, {pipeline_mode = #tpu.pipeline_mode<synchronous>, transform_indices = @transform_1, window_bounds = array<i64: 16, 32>}, {pipeline_mode = #tpu.pipeline_mode<synchronous>, transform_indices = @transform_2, window_bounds = array<i64: 1, 32>}, {pipeline_mode = #tpu.pipeline_mode<synchronous>, transform_indices = @transform_3, window_bounds = array<i64: 1, 32>}, {pipeline_mode = #tpu.pipeline_mode<synchronous>, transform_indices = @transform_4, window_bounds = array<i64: 17, 32>}, {pipeline_mode = #tpu.pipeline_mode<synchronous>, transform_indices = @transform_5, window_bounds = array<i64: 34, 32>}]} {
    %c0 = arith.constant 0 : index
    %c0_0 = arith.constant 0 : index
    %0 = vector.load %arg1[%c0, %c0_0] : memref<32x16xf32, #tpu.memory_space<vmem>>, vector<32x16xf32>
    %c0_1 = arith.constant 0 : index
    %c0_2 = arith.constant 0 : index
    %1 = vector.load %arg2[%c0_1, %c0_2] : memref<16x32xf32, #tpu.memory_space<vmem>>, vector<16x32xf32>
    %cst = arith.constant dense<0.000000e+00> : vector<32x32xf32>
    %2 = tpu.matmul %0, %1, %cst {dimension_numbers = #tpu.dot_dimension_numbers<[1], [0], [0], [1], [0, 0, 1, 1], [], []>} : vector<32x16xf32>, vector<16x32xf32>, vector<32x32xf32> -> vector<32x32xf32>
    %c0_3 = arith.constant 0 : index
    %c0_4 = arith.constant 0 : index
    %3 = vector.load %arg3[%c0_3, %c0_4] : memref<1x32xf32, #tpu.memory_space<vmem>>, vector<1x32xf32>
    %4 = vector.broadcast %3 : vector<1x32xf32> to vector<32x32xf32>
    %5 = arith.addf %2, %4 : vector<32x32xf32>
    %c0_5 = arith.constant 0 : index
    %c0_6 = arith.constant 0 : index
    %6 = vector.load %arg5[%c0_5, %c0_6] : memref<17x32xf32, #tpu.memory_space<vmem>>, vector<17x32xf32>
    %c0_7 = arith.constant 0 : index
    %c0_8 = arith.constant 0 : index
    %7 = vector.load %arg4[%c0_7, %c0_8] : memref<1x32xf32, #tpu.memory_space<vmem>>, vector<1x32xf32>
    %8 = vector.extract_strided_slice %6 {offsets = [0, 0], sizes = [1, 32], strides = [1, 1]} : vector<17x32xf32> to vector<1x32xf32>
    %9 = arith.addf %7, %8 : vector<1x32xf32>
    %10 = vector.extract_strided_slice %6 {offsets = [1, 0], sizes = [16, 32], strides = [1, 1]} : vector<17x32xf32> to vector<16x32xf32>
    %c0_9 = arith.constant 0 : index
    %c0_10 = arith.constant 0 : index
    %11 = vector.load %arg6[%c0_9, %c0_10] : memref<34x32xf32, #tpu.memory_space<vmem>>, vector<1x32xf32>
    tpu.vector_store %arg6[%c0_9, %c0_10], %9 {strides = array<i32>} : memref<34x32xf32, #tpu.memory_space<vmem>>, vector<1x32xf32>,
    %12 = vector.extract_strided_slice %5 {offsets = [0, 0], sizes = [16, 32], strides = [1, 1]} : vector<32x32xf32> to vector<16x32xf32>
    %13 = arith.addf %12, %10 : vector<16x32xf32>
    %c1 = arith.constant 1 : index
    %c0_11 = arith.constant 0 : index
    %14 = vector.load %arg6[%c1, %c0_11] : memref<34x32xf32, #tpu.memory_space<vmem>>, vector<16x32xf32>
    tpu.vector_store %arg6[%c1, %c0_11], %13 {strides = array<i32>} : memref<34x32xf32, #tpu.memory_space<vmem>>, vector<16x32xf32>,
    %c17 = arith.constant 17 : index
    %c0_12 = arith.constant 0 : index
    %15 = vector.load %arg6[%c17, %c0_12] : memref<34x32xf32, #tpu.memory_space<vmem>>, vector<1x32xf32>
    tpu.vector_store %arg6[%c17, %c0_12], %9 {strides = array<i32>} : memref<34x32xf32, #tpu.memory_space<vmem>>, vector<1x32xf32>,
    %16 = vector.extract_strided_slice %5 {offsets = [16, 0], sizes = [16, 32], strides = [1, 1]} : vector<32x32xf32> to vector<16x32xf32>
    %17 = arith.addf %16, %10 : vector<16x32xf32>
    %c18 = arith.constant 18 : index
    %c0_13 = arith.constant 0 : index
    %18 = vector.load %arg6[%c18, %c0_13] : memref<34x32xf32, #tpu.memory_space<vmem>>, vector<16x32xf32>
    tpu.vector_store %arg6[%c18, %c0_13], %17 {strides = array<i32>} : memref<34x32xf32, #tpu.memory_space<vmem>>, vector<16x32xf32>,
    return
  }
  func.func @transform_0(%arg0: i32) -> (i32, i32) {
    %c0_i32 = arith.constant 0 : i32
    %c0_i32_0 = arith.constant 0 : i32
    %c0_i32_1 = arith.constant 0 : i32
    return %c0_i32, %c0_i32_0 : i32, i32
  }
  func.func @transform_1(%arg0: i32) -> (i32, i32) {
    %c0_i32 = arith.constant 0 : i32
    %c0_i32_0 = arith.constant 0 : i32
    %c0_i32_1 = arith.constant 0 : i32
    return %c0_i32, %c0_i32_0 : i32, i32
  }
  func.func @transform_2(%arg0: i32) -> (i32, i32) {
    %c0_i32 = arith.constant 0 : i32
    %c0_i32_0 = arith.constant 0 : i32
    %c0_i32_1 = arith.constant 0 : i32
    return %c0_i32, %c0_i32_0 : i32, i32
  }
  func.func @transform_3(%arg0: i32) -> (i32, i32) {
    %c0_i32 = arith.constant 0 : i32
    %c0_i32_0 = arith.constant 0 : i32
    %c0_i32_1 = arith.constant 0 : i32
    return %c0_i32, %c0_i32_0 : i32, i32
  }
  func.func @transform_4(%arg0: i32) -> (i32, i32) {
    %c0_i32 = arith.constant 0 : i32
    %c0_i32_0 = arith.constant 0 : i32
    %c0_i32_1 = arith.constant 0 : i32
    return %c0_i32, %c0_i32_0 : i32, i32
  }
  func.func @transform_5(%arg0: i32) -> (i32, i32) {
    %c0_i32 = arith.constant 0 : i32
    %c0_i32_0 = arith.constant 0 : i32
    %c0_i32_1 = arith.constant 0 : i32
    return %c0_i32, %c0_i32_0 : i32, i32
  }
}

module attributes {stable_mosaic.version = 11 : i64} {
  func.func @_head_mlp_kernel(%arg0: i32, %arg1: memref<2x32xf32, #tpu.memory_space<vmem>>, %arg2: memref<1x32xf32, #tpu.memory_space<vmem>>, %arg3: memref<1x32xf32, #tpu.memory_space<vmem>>, %arg4: memref<32x32xf32, #tpu.memory_space<vmem>>, %arg5: memref<1x32xf32, #tpu.memory_space<vmem>>, %arg6: memref<2x32xf32, #tpu.memory_space<vmem>>) attributes {dimension_semantics = [#tpu.dimension_semantics<arbitrary>], iteration_bounds = array<i64: 1>, scalar_prefetch = 0 : i64, scratch_operands = 0 : i64, tpu.core_type = #tpu.core_type<tc>, window_params = [{pipeline_mode = #tpu.pipeline_mode<synchronous>, transform_indices = @transform_0, window_bounds = array<i64: 2, 32>}, {pipeline_mode = #tpu.pipeline_mode<synchronous>, transform_indices = @transform_1, window_bounds = array<i64: 1, 32>}, {pipeline_mode = #tpu.pipeline_mode<synchronous>, transform_indices = @transform_2, window_bounds = array<i64: 1, 32>}, {pipeline_mode = #tpu.pipeline_mode<synchronous>, transform_indices = @transform_3, window_bounds = array<i64: 32, 32>}, {pipeline_mode = #tpu.pipeline_mode<synchronous>, transform_indices = @transform_4, window_bounds = array<i64: 1, 32>}, {pipeline_mode = #tpu.pipeline_mode<synchronous>, transform_indices = @transform_5, window_bounds = array<i64: 2, 32>}]} {
    %c0 = arith.constant 0 : index
    %c0_0 = arith.constant 0 : index
    %0 = vector.load %arg1[%c0, %c0_0] : memref<2x32xf32, #tpu.memory_space<vmem>>, vector<2x32xf32>
    %cst = arith.constant dense<0.000000e+00> : vector<2xf32>
    %1 = vector.multi_reduction <add>, %0, %cst [1] : vector<2x32xf32> to vector<2xf32>
    %2 = vector.shape_cast %1 : vector<2xf32> to vector<2x1xf32>
    %cst_1 = arith.constant 3.200000e+01 : f32
    %3 = vector.broadcast %cst_1 : f32 to vector<2x1xf32>
    %4 = arith.divf %2, %3 : vector<2x1xf32>
    %5 = vector.broadcast %4 : vector<2x1xf32> to vector<2x32xf32>
    %6 = arith.subf %0, %5 : vector<2x32xf32>
    %7 = arith.mulf %6, %6 : vector<2x32xf32>
    %cst_2 = arith.constant dense<0.000000e+00> : vector<2xf32>
    %8 = vector.multi_reduction <add>, %7, %cst_2 [1] : vector<2x32xf32> to vector<2xf32>
    %9 = vector.shape_cast %8 : vector<2xf32> to vector<2x1xf32>
    %cst_3 = arith.constant 3.200000e+01 : f32
    %10 = vector.broadcast %cst_3 : f32 to vector<2x1xf32>
    %11 = arith.divf %9, %10 : vector<2x1xf32>
    %12 = vector.broadcast %4 : vector<2x1xf32> to vector<2x32xf32>
    %13 = arith.subf %0, %12 : vector<2x32xf32>
    %cst_4 = arith.constant 9.99999974E-6 : f32
    %14 = vector.broadcast %cst_4 : f32 to vector<2x1xf32>
    %15 = arith.addf %11, %14 : vector<2x1xf32>
    %16 = math.rsqrt %15 : vector<2x1xf32>
    %17 = vector.broadcast %16 : vector<2x1xf32> to vector<2x32xf32>
    %18 = arith.mulf %13, %17 : vector<2x32xf32>
    %c0_5 = arith.constant 0 : index
    %c0_6 = arith.constant 0 : index
    %19 = vector.load %arg2[%c0_5, %c0_6] : memref<1x32xf32, #tpu.memory_space<vmem>>, vector<1x32xf32>
    %20 = vector.broadcast %19 : vector<1x32xf32> to vector<2x32xf32>
    %21 = arith.mulf %18, %20 : vector<2x32xf32>
    %c0_7 = arith.constant 0 : index
    %c0_8 = arith.constant 0 : index
    %22 = vector.load %arg3[%c0_7, %c0_8] : memref<1x32xf32, #tpu.memory_space<vmem>>, vector<1x32xf32>
    %23 = vector.broadcast %22 : vector<1x32xf32> to vector<2x32xf32>
    %24 = arith.addf %21, %23 : vector<2x32xf32>
    %c0_9 = arith.constant 0 : index
    %c0_10 = arith.constant 0 : index
    %25 = vector.load %arg4[%c0_9, %c0_10] : memref<32x32xf32, #tpu.memory_space<vmem>>, vector<32x32xf32>
    %cst_11 = arith.constant dense<0.000000e+00> : vector<2x32xf32>
    %26 = tpu.matmul %24, %25, %cst_11 {dimension_numbers = #tpu.dot_dimension_numbers<[1], [0], [0], [1], [0, 0, 1, 1], [], []>} : vector<2x32xf32>, vector<32x32xf32>, vector<2x32xf32> -> vector<2x32xf32>
    %c0_12 = arith.constant 0 : index
    %c0_13 = arith.constant 0 : index
    %27 = vector.load %arg5[%c0_12, %c0_13] : memref<1x32xf32, #tpu.memory_space<vmem>>, vector<1x32xf32>
    %28 = vector.broadcast %27 : vector<1x32xf32> to vector<2x32xf32>
    %29 = arith.addf %26, %28 : vector<2x32xf32>
    %c0_14 = arith.constant 0 : index
    %c0_15 = arith.constant 0 : index
    %30 = vector.load %arg6[%c0_14, %c0_15] : memref<2x32xf32, #tpu.memory_space<vmem>>, vector<2x32xf32>
    tpu.vector_store %arg6[%c0_14, %c0_15], %29 {strides = array<i32>} : memref<2x32xf32, #tpu.memory_space<vmem>>, vector<2x32xf32>,
    return
  }
  func.func @transform_0(%arg0: i32) -> (i32, i32) {
    %c0_i32 = arith.constant 0 : i32
    %c0_i32_0 = arith.constant 0 : i32
    %c0_i32_1 = arith.constant 0 : i32
    return %c0_i32, %c0_i32_0 : i32, i32
  }
  func.func @transform_1(%arg0: i32) -> (i32, i32) {
    %c0_i32 = arith.constant 0 : i32
    %c0_i32_0 = arith.constant 0 : i32
    %c0_i32_1 = arith.constant 0 : i32
    return %c0_i32, %c0_i32_0 : i32, i32
  }
  func.func @transform_2(%arg0: i32) -> (i32, i32) {
    %c0_i32 = arith.constant 0 : i32
    %c0_i32_0 = arith.constant 0 : i32
    %c0_i32_1 = arith.constant 0 : i32
    return %c0_i32, %c0_i32_0 : i32, i32
  }
  func.func @transform_3(%arg0: i32) -> (i32, i32) {
    %c0_i32 = arith.constant 0 : i32
    %c0_i32_0 = arith.constant 0 : i32
    %c0_i32_1 = arith.constant 0 : i32
    return %c0_i32, %c0_i32_0 : i32, i32
  }
  func.func @transform_4(%arg0: i32) -> (i32, i32) {
    %c0_i32 = arith.constant 0 : i32
    %c0_i32_0 = arith.constant 0 : i32
    %c0_i32_1 = arith.constant 0 : i32
    return %c0_i32, %c0_i32_0 : i32, i32
  }
  func.func @transform_5(%arg0: i32) -> (i32, i32) {
    %c0_i32 = arith.constant 0 : i32
    %c0_i32_0 = arith.constant 0 : i32
    %c0_i32_1 = arith.constant 0 : i32
    return %c0_i32, %c0_i32_0 : i32, i32
  }
}

module attributes {stable_mosaic.version = 11 : i64} {
  func.func @_encoder_stack_kernel(%arg0: i32, %arg1: memref<34x32xf32, #tpu.memory_space<vmem>>, %arg2: memref<1x32x32xf32, #tpu.memory_space<vmem>>, %arg3: memref<1x1x32xf32, #tpu.memory_space<vmem>>, %arg4: memref<1x32x32xf32, #tpu.memory_space<vmem>>, %arg5: memref<1x1x32xf32, #tpu.memory_space<vmem>>, %arg6: memref<1x32x32xf32, #tpu.memory_space<vmem>>, %arg7: memref<1x1x32xf32, #tpu.memory_space<vmem>>, %arg8: memref<1x32x32xf32, #tpu.memory_space<vmem>>, %arg9: memref<1x1x32xf32, #tpu.memory_space<vmem>>, %arg10: memref<1x1x32xf32, #tpu.memory_space<vmem>>, %arg11: memref<1x1x32xf32, #tpu.memory_space<vmem>>, %arg12: memref<1x32x64xf32, #tpu.memory_space<vmem>>, %arg13: memref<1x1x64xf32, #tpu.memory_space<vmem>>, %arg14: memref<1x64x32xf32, #tpu.memory_space<vmem>>, %arg15: memref<1x1x32xf32, #tpu.memory_space<vmem>>, %arg16: memref<1x1x32xf32, #tpu.memory_space<vmem>>, %arg17: memref<1x1x32xf32, #tpu.memory_space<vmem>>, %arg18: memref<34x32xf32, #tpu.memory_space<vmem>>, %arg19: memref<34x32xf32, #tpu.memory_space<vmem>>, %arg20: memref<34x32xf32, #tpu.memory_space<vmem>>) attributes {dimension_semantics = [#tpu.dimension_semantics<arbitrary>], iteration_bounds = array<i64: 2>, scalar_prefetch = 0 : i64, scratch_operands = 2 : i64, tpu.core_type = #tpu.core_type<tc>, window_params = [{pipeline_mode = #tpu.pipeline_mode<synchronous>, transform_indices = @transform_0, window_bounds = array<i64: 34, 32>}, {transform_indices = @transform_1, window_bounds = array<i64: 1, 32, 32>}, {transform_indices = @transform_2, window_bounds = array<i64: 1, 1, 32>}, {transform_indices = @transform_3, window_bounds = array<i64: 1, 32, 32>}, {transform_indices = @transform_4, window_bounds = array<i64: 1, 1, 32>}, {transform_indices = @transform_5, window_bounds = array<i64: 1, 32, 32>}, {transform_indices = @transform_6, window_bounds = array<i64: 1, 1, 32>}, {transform_indices = @transform_7, window_bounds = array<i64: 1, 32, 32>}, {transform_indices = @transform_8, window_bounds = array<i64: 1, 1, 32>}, {transform_indices = @transform_9, window_bounds = array<i64: 1, 1, 32>}, {transform_indices = @transform_10, window_bounds = array<i64: 1, 1, 32>}, {transform_indices = @transform_11, window_bounds = array<i64: 1, 32, 64>}, {transform_indices = @transform_12, window_bounds = array<i64: 1, 1, 64>}, {transform_indices = @transform_13, window_bounds = array<i64: 1, 64, 32>}, {transform_indices = @transform_14, window_bounds = array<i64: 1, 1, 32>}, {transform_indices = @transform_15, window_bounds = array<i64: 1, 1, 32>}, {transform_indices = @transform_16, window_bounds = array<i64: 1, 1, 32>}, {pipeline_mode = #tpu.pipeline_mode<synchronous>, transform_indices = @transform_17, window_bounds = array<i64: 34, 32>}]} {
    %c0_i32 = arith.constant 0 : i32
    %0 = arith.cmpi eq, %arg0, %c0_i32 : i32
    %1 = arith.extui %0 : i1 to i32
    %c0_i32_0 = arith.constant 0 : i32
    %2 = arith.cmpi ne, %1, %c0_i32_0 : i32
    scf.if %2 {
      %c0_96 = arith.constant 0 : index
      %c0_97 = arith.constant 0 : index
      %191 = vector.load %arg1[%c0_96, %c0_97] : memref<34x32xf32, #tpu.memory_space<vmem>>, vector<34x32xf32>
      %c0_98 = arith.constant 0 : index
      %c0_99 = arith.constant 0 : index
      %192 = vector.load %arg19[%c0_98, %c0_99] : memref<34x32xf32, #tpu.memory_space<vmem>>, vector<34x32xf32>
      tpu.vector_store %arg19[%c0_98, %c0_99], %191 {strides = array<i32>} : memref<34x32xf32, #tpu.memory_space<vmem>>, vector<34x32xf32>,
    } else {
    }
    %c0 = arith.constant 0 : index
    %c0_1 = arith.constant 0 : index
    %3 = vector.load %arg19[%c0, %c0_1] : memref<34x32xf32, #tpu.memory_space<vmem>>, vector<34x32xf32>
    %c0_2 = arith.constant 0 : index
    %c0_3 = arith.constant 0 : index
    %c0_4 = arith.constant 0 : index
    %4 = vector.load %arg2[%c0_2, %c0_3, %c0_4] : memref<1x32x32xf32, #tpu.memory_space<vmem>>, vector<1x32x32xf32>
    %5 = vector.shape_cast %4 : vector<1x32x32xf32> to vector<32x32xf32>
    %c0_5 = arith.constant 0 : index
    %c0_6 = arith.constant 0 : index
    %c0_7 = arith.constant 0 : index
    %6 = vector.load %arg3[%c0_5, %c0_6, %c0_7] : memref<1x1x32xf32, #tpu.memory_space<vmem>>, vector<1x1x32xf32>
    %7 = vector.shape_cast %6 : vector<1x1x32xf32> to vector<1x32xf32>
    %c0_8 = arith.constant 0 : index
    %c0_9 = arith.constant 0 : index
    %c0_10 = arith.constant 0 : index
    %8 = vector.load %arg4[%c0_8, %c0_9, %c0_10] : memref<1x32x32xf32, #tpu.memory_space<vmem>>, vector<1x32x32xf32>
    %9 = vector.shape_cast %8 : vector<1x32x32xf32> to vector<32x32xf32>
    %c0_11 = arith.constant 0 : index
    %c0_12 = arith.constant 0 : index
    %c0_13 = arith.constant 0 : index
    %10 = vector.load %arg5[%c0_11, %c0_12, %c0_13] : memref<1x1x32xf32, #tpu.memory_space<vmem>>, vector<1x1x32xf32>
    %11 = vector.shape_cast %10 : vector<1x1x32xf32> to vector<1x32xf32>
    %c0_14 = arith.constant 0 : index
    %c0_15 = arith.constant 0 : index
    %c0_16 = arith.constant 0 : index
    %12 = vector.load %arg6[%c0_14, %c0_15, %c0_16] : memref<1x32x32xf32, #tpu.memory_space<vmem>>, vector<1x32x32xf32>
    %13 = vector.shape_cast %12 : vector<1x32x32xf32> to vector<32x32xf32>
    %c0_17 = arith.constant 0 : index
    %c0_18 = arith.constant 0 : index
    %c0_19 = arith.constant 0 : index
    %14 = vector.load %arg7[%c0_17, %c0_18, %c0_19] : memref<1x1x32xf32, #tpu.memory_space<vmem>>, vector<1x1x32xf32>
    %15 = vector.shape_cast %14 : vector<1x1x32xf32> to vector<1x32xf32>
    %c0_20 = arith.constant 0 : index
    %c0_21 = arith.constant 0 : index
    %c0_22 = arith.constant 0 : index
    %16 = vector.load %arg8[%c0_20, %c0_21, %c0_22] : memref<1x32x32xf32, #tpu.memory_space<vmem>>, vector<1x32x32xf32>
    %17 = vector.shape_cast %16 : vector<1x32x32xf32> to vector<32x32xf32>
    %c0_23 = arith.constant 0 : index
    %c0_24 = arith.constant 0 : index
    %c0_25 = arith.constant 0 : index
    %18 = vector.load %arg9[%c0_23, %c0_24, %c0_25] : memref<1x1x32xf32, #tpu.memory_space<vmem>>, vector<1x1x32xf32>
    %19 = vector.shape_cast %18 : vector<1x1x32xf32> to vector<1x32xf32>
    %c0_26 = arith.constant 0 : index
    %c0_27 = arith.constant 0 : index
    %c0_28 = arith.constant 0 : index
    %20 = vector.load %arg10[%c0_26, %c0_27, %c0_28] : memref<1x1x32xf32, #tpu.memory_space<vmem>>, vector<1x1x32xf32>
    %21 = vector.shape_cast %20 : vector<1x1x32xf32> to vector<1x32xf32>
    %c0_29 = arith.constant 0 : index
    %c0_30 = arith.constant 0 : index
    %c0_31 = arith.constant 0 : index
    %22 = vector.load %arg11[%c0_29, %c0_30, %c0_31] : memref<1x1x32xf32, #tpu.memory_space<vmem>>, vector<1x1x32xf32>
    %23 = vector.shape_cast %22 : vector<1x1x32xf32> to vector<1x32xf32>
    %c0_32 = arith.constant 0 : index
    %c0_33 = arith.constant 0 : index
    %c0_34 = arith.constant 0 : index
    %24 = vector.load %arg12[%c0_32, %c0_33, %c0_34] : memref<1x32x64xf32, #tpu.memory_space<vmem>>, vector<1x32x64xf32>
    %25 = vector.shape_cast %24 : vector<1x32x64xf32> to vector<32x64xf32>
    %c0_35 = arith.constant 0 : index
    %c0_36 = arith.constant 0 : index
    %c0_37 = arith.constant 0 : index
    %26 = vector.load %arg13[%c0_35, %c0_36, %c0_37] : memref<1x1x64xf32, #tpu.memory_space<vmem>>, vector<1x1x64xf32>
    %27 = vector.shape_cast %26 : vector<1x1x64xf32> to vector<1x64xf32>
    %c0_38 = arith.constant 0 : index
    %c0_39 = arith.constant 0 : index
    %c0_40 = arith.constant 0 : index
    %28 = vector.load %arg14[%c0_38, %c0_39, %c0_40] : memref<1x64x32xf32, #tpu.memory_space<vmem>>, vector<1x64x32xf32>
    %29 = vector.shape_cast %28 : vector<1x64x32xf32> to vector<64x32xf32>
    %c0_41 = arith.constant 0 : index
    %c0_42 = arith.constant 0 : index
    %c0_43 = arith.constant 0 : index
    %30 = vector.load %arg15[%c0_41, %c0_42, %c0_43] : memref<1x1x32xf32, #tpu.memory_space<vmem>>, vector<1x1x32xf32>
    %31 = vector.shape_cast %30 : vector<1x1x32xf32> to vector<1x32xf32>
    %c0_44 = arith.constant 0 : index
    %c0_45 = arith.constant 0 : index
    %c0_46 = arith.constant 0 : index
    %32 = vector.load %arg16[%c0_44, %c0_45, %c0_46] : memref<1x1x32xf32, #tpu.memory_space<vmem>>, vector<1x1x32xf32>
    %33 = vector.shape_cast %32 : vector<1x1x32xf32> to vector<1x32xf32>
    %c0_47 = arith.constant 0 : index
    %c0_48 = arith.constant 0 : index
    %c0_49 = arith.constant 0 : index
    %34 = vector.load %arg17[%c0_47, %c0_48, %c0_49] : memref<1x1x32xf32, #tpu.memory_space<vmem>>, vector<1x1x32xf32>
    %35 = vector.shape_cast %34 : vector<1x1x32xf32> to vector<1x32xf32>
    %cst = arith.constant dense<0.000000e+00> : vector<34x32xf32>
    %36 = tpu.matmul %3, %5, %cst {dimension_numbers = #tpu.dot_dimension_numbers<[1], [0], [0], [1], [0, 0, 1, 1], [], []>} : vector<34x32xf32>, vector<32x32xf32>, vector<34x32xf32> -> vector<34x32xf32>
    %37 = vector.broadcast %7 : vector<1x32xf32> to vector<34x32xf32>
    %38 = arith.addf %36, %37 : vector<34x32xf32>
    %cst_50 = arith.constant 0.353553385 : f32
    %39 = vector.broadcast %cst_50 : f32 to vector<34x32xf32>
    %40 = arith.mulf %38, %39 : vector<34x32xf32>
    %cst_51 = arith.constant dense<0.000000e+00> : vector<34x32xf32>
    %41 = tpu.matmul %3, %9, %cst_51 {dimension_numbers = #tpu.dot_dimension_numbers<[1], [0], [0], [1], [0, 0, 1, 1], [], []>} : vector<34x32xf32>, vector<32x32xf32>, vector<34x32xf32> -> vector<34x32xf32>
    %42 = vector.broadcast %11 : vector<1x32xf32> to vector<34x32xf32>
    %43 = arith.addf %41, %42 : vector<34x32xf32>
    %cst_52 = arith.constant dense<0.000000e+00> : vector<34x32xf32>
    %44 = tpu.matmul %3, %13, %cst_52 {dimension_numbers = #tpu.dot_dimension_numbers<[1], [0], [0], [1], [0, 0, 1, 1], [], []>} : vector<34x32xf32>, vector<32x32xf32>, vector<34x32xf32> -> vector<34x32xf32>
    %45 = vector.broadcast %15 : vector<1x32xf32> to vector<34x32xf32>
    %46 = arith.addf %44, %45 : vector<34x32xf32>
    %47 = tpu.iota {dimensions = array<i32: 0>} : vector<32x4xi32>
    %48 = tpu.iota {dimensions = array<i32: 1>} : vector<32x4xi32>
    %c8_i32 = arith.constant 8 : i32
    %49 = vector.broadcast %c8_i32 : i32 to vector<32x4xi32>
    %50 = arith.muli %48, %49 : vector<32x4xi32>
    %51 = arith.cmpi sge, %47, %50 : vector<32x4xi32>
    %c1_i32 = arith.constant 1 : i32
    %52 = vector.broadcast %c1_i32 : i32 to vector<32x4xi32>
    %53 = arith.addi %48, %52 : vector<32x4xi32>
    %c8_i32_53 = arith.constant 8 : i32
    %54 = vector.broadcast %c8_i32_53 : i32 to vector<32x4xi32>
    %55 = arith.muli %53, %54 : vector<32x4xi32>
    %56 = arith.cmpi slt, %47, %55 : vector<32x4xi32>
    %57 = arith.andi %51, %56 : vector<32x4xi1>
    %cst_54 = arith.constant 1.000000e+00 : f32
    %cst_55 = arith.constant 0.000000e+00 : f32
    %58 = vector.broadcast %cst_54 : f32 to vector<32x4xf32>
    %59 = vector.broadcast %cst_55 : f32 to vector<32x4xf32>
    %60 = arith.select %57, %58, %59 : vector<32x4xi1>, vector<32x4xf32>
    %61 = tpu.iota {dimensions = array<i32: 0>} : vector<4x32xi32>
    %62 = tpu.iota {dimensions = array<i32: 1>} : vector<4x32xi32>
    %c8_i32_56 = arith.constant 8 : i32
    %63 = vector.broadcast %c8_i32_56 : i32 to vector<4x32xi32>
    %64 = arith.muli %61, %63 : vector<4x32xi32>
    %65 = arith.cmpi sge, %62, %64 : vector<4x32xi32>
    %c1_i32_57 = arith.constant 1 : i32
    %66 = vector.broadcast %c1_i32_57 : i32 to vector<4x32xi32>
    %67 = arith.addi %61, %66 : vector<4x32xi32>
    %c8_i32_58 = arith.constant 8 : i32
    %68 = vector.broadcast %c8_i32_58 : i32 to vector<4x32xi32>
    %69 = arith.muli %67, %68 : vector<4x32xi32>
    %70 = arith.cmpi slt, %62, %69 : vector<4x32xi32>
    %71 = arith.andi %65, %70 : vector<4x32xi1>
    %cst_59 = arith.constant 1.000000e+00 : f32
    %cst_60 = arith.constant 0.000000e+00 : f32
    %72 = vector.broadcast %cst_59 : f32 to vector<4x32xf32>
    %73 = vector.broadcast %cst_60 : f32 to vector<4x32xf32>
    %74 = arith.select %71, %72, %73 : vector<4x32xi1>, vector<4x32xf32>
    %75 = vector.extract_strided_slice %40 {offsets = [0, 0], sizes = [17, 32], strides = [1, 1]} : vector<34x32xf32> to vector<17x32xf32>
    %76 = vector.extract_strided_slice %43 {offsets = [0, 0], sizes = [17, 32], strides = [1, 1]} : vector<34x32xf32> to vector<17x32xf32>
    %77 = arith.mulf %75, %76 : vector<17x32xf32>
    %cst_61 = arith.constant dense<0.000000e+00> : vector<17x4xf32>
    %78 = tpu.matmul %77, %60, %cst_61 {dimension_numbers = #tpu.dot_dimension_numbers<[1], [0], [0], [1], [0, 0, 1, 1], [], []>} : vector<17x32xf32>, vector<32x4xf32>, vector<17x4xf32> -> vector<17x4xf32>
    %79 = vector.extract_strided_slice %43 {offsets = [17, 0], sizes = [17, 32], strides = [1, 1]} : vector<34x32xf32> to vector<17x32xf32>
    %80 = arith.mulf %75, %79 : vector<17x32xf32>
    %cst_62 = arith.constant dense<0.000000e+00> : vector<17x4xf32>
    %81 = tpu.matmul %80, %60, %cst_62 {dimension_numbers = #tpu.dot_dimension_numbers<[1], [0], [0], [1], [0, 0, 1, 1], [], []>} : vector<17x32xf32>, vector<32x4xf32>, vector<17x4xf32> -> vector<17x4xf32>
    %82 = arith.maximumf %78, %81 : vector<17x4xf32>
    %83 = arith.subf %78, %82 : vector<17x4xf32>
    %84 = math.exp %83 : vector<17x4xf32>
    %85 = arith.subf %81, %82 : vector<17x4xf32>
    %86 = math.exp %85 : vector<17x4xf32>
    %87 = arith.addf %84, %86 : vector<17x4xf32>
    %cst_63 = arith.constant 1.000000e+00 : f32
    %88 = vector.broadcast %cst_63 : f32 to vector<17x4xf32>
    %89 = arith.divf %88, %87 : vector<17x4xf32>
    %cst_64 = arith.constant 0.000000e+00 : f32
    %90 = vector.broadcast %cst_64 : f32 to vector<17x32xf32>
    %91 = arith.mulf %84, %89 : vector<17x4xf32>
    %cst_65 = arith.constant dense<0.000000e+00> : vector<17x32xf32>
    %92 = tpu.matmul %91, %74, %cst_65 {dimension_numbers = #tpu.dot_dimension_numbers<[1], [0], [0], [1], [0, 0, 1, 1], [], []>} : vector<17x4xf32>, vector<4x32xf32>, vector<17x32xf32> -> vector<17x32xf32>
    %93 = vector.extract_strided_slice %46 {offsets = [0, 0], sizes = [17, 32], strides = [1, 1]} : vector<34x32xf32> to vector<17x32xf32>
    %94 = arith.mulf %92, %93 : vector<17x32xf32>
    %95 = arith.addf %90, %94 : vector<17x32xf32>
    %96 = arith.mulf %86, %89 : vector<17x4xf32>
    %cst_66 = arith.constant dense<0.000000e+00> : vector<17x32xf32>
    %97 = tpu.matmul %96, %74, %cst_66 {dimension_numbers = #tpu.dot_dimension_numbers<[1], [0], [0], [1], [0, 0, 1, 1], [], []>} : vector<17x4xf32>, vector<4x32xf32>, vector<17x32xf32> -> vector<17x32xf32>
    %98 = vector.extract_strided_slice %46 {offsets = [17, 0], sizes = [17, 32], strides = [1, 1]} : vector<34x32xf32> to vector<17x32xf32>
    %99 = arith.mulf %97, %98 : vector<17x32xf32>
    %100 = arith.addf %95, %99 : vector<17x32xf32>
    %c0_67 = arith.constant 0 : index
    %c0_68 = arith.constant 0 : index
    %101 = vector.load %arg20[%c0_67, %c0_68] : memref<34x32xf32, #tpu.memory_space<vmem>>, vector<17x32xf32>
    tpu.vector_store %arg20[%c0_67, %c0_68], %100 {strides = array<i32>} : memref<34x32xf32, #tpu.memory_space<vmem>>, vector<17x32xf32>,
    %102 = vector.extract_strided_slice %40 {offsets = [17, 0], sizes = [17, 32], strides = [1, 1]} : vector<34x32xf32> to vector<17x32xf32>
    %103 = vector.extract_strided_slice %43 {offsets = [0, 0], sizes = [17, 32], strides = [1, 1]} : vector<34x32xf32> to vector<17x32xf32>
    %104 = arith.mulf %102, %103 : vector<17x32xf32>
    %cst_69 = arith.constant dense<0.000000e+00> : vector<17x4xf32>
    %105 = tpu.matmul %104, %60, %cst_69 {dimension_numbers = #tpu.dot_dimension_numbers<[1], [0], [0], [1], [0, 0, 1, 1], [], []>} : vector<17x32xf32>, vector<32x4xf32>, vector<17x4xf32> -> vector<17x4xf32>
    %106 = vector.extract_strided_slice %43 {offsets = [17, 0], sizes = [17, 32], strides = [1, 1]} : vector<34x32xf32> to vector<17x32xf32>
    %107 = arith.mulf %102, %106 : vector<17x32xf32>
    %cst_70 = arith.constant dense<0.000000e+00> : vector<17x4xf32>
    %108 = tpu.matmul %107, %60, %cst_70 {dimension_numbers = #tpu.dot_dimension_numbers<[1], [0], [0], [1], [0, 0, 1, 1], [], []>} : vector<17x32xf32>, vector<32x4xf32>, vector<17x4xf32> -> vector<17x4xf32>
    %109 = arith.maximumf %105, %108 : vector<17x4xf32>
    %110 = arith.subf %105, %109 : vector<17x4xf32>
    %111 = math.exp %110 : vector<17x4xf32>
    %112 = arith.subf %108, %109 : vector<17x4xf32>
    %113 = math.exp %112 : vector<17x4xf32>
    %114 = arith.addf %111, %113 : vector<17x4xf32>
    %cst_71 = arith.constant 1.000000e+00 : f32
    %115 = vector.broadcast %cst_71 : f32 to vector<17x4xf32>
    %116 = arith.divf %115, %114 : vector<17x4xf32>
    %cst_72 = arith.constant 0.000000e+00 : f32
    %117 = vector.broadcast %cst_72 : f32 to vector<17x32xf32>
    %118 = arith.mulf %111, %116 : vector<17x4xf32>
    %cst_73 = arith.constant dense<0.000000e+00> : vector<17x32xf32>
    %119 = tpu.matmul %118, %74, %cst_73 {dimension_numbers = #tpu.dot_dimension_numbers<[1], [0], [0], [1], [0, 0, 1, 1], [], []>} : vector<17x4xf32>, vector<4x32xf32>, vector<17x32xf32> -> vector<17x32xf32>
    %120 = vector.extract_strided_slice %46 {offsets = [0, 0], sizes = [17, 32], strides = [1, 1]} : vector<34x32xf32> to vector<17x32xf32>
    %121 = arith.mulf %119, %120 : vector<17x32xf32>
    %122 = arith.addf %117, %121 : vector<17x32xf32>
    %123 = arith.mulf %113, %116 : vector<17x4xf32>
    %cst_74 = arith.constant dense<0.000000e+00> : vector<17x32xf32>
    %124 = tpu.matmul %123, %74, %cst_74 {dimension_numbers = #tpu.dot_dimension_numbers<[1], [0], [0], [1], [0, 0, 1, 1], [], []>} : vector<17x4xf32>, vector<4x32xf32>, vector<17x32xf32> -> vector<17x32xf32>
    %125 = vector.extract_strided_slice %46 {offsets = [17, 0], sizes = [17, 32], strides = [1, 1]} : vector<34x32xf32> to vector<17x32xf32>
    %126 = arith.mulf %124, %125 : vector<17x32xf32>
    %127 = arith.addf %122, %126 : vector<17x32xf32>
    %c17 = arith.constant 17 : index
    %c0_75 = arith.constant 0 : index
    %128 = vector.load %arg20[%c17, %c0_75] : memref<34x32xf32, #tpu.memory_space<vmem>>, vector<17x32xf32>
    tpu.vector_store %arg20[%c17, %c0_75], %127 {strides = array<i32>} : memref<34x32xf32, #tpu.memory_space<vmem>>, vector<17x32xf32>,
    %c0_76 = arith.constant 0 : index
    %c0_77 = arith.constant 0 : index
    %129 = vector.load %arg20[%c0_76, %c0_77] : memref<34x32xf32, #tpu.memory_space<vmem>>, vector<34x32xf32>
    %cst_78 = arith.constant dense<0.000000e+00> : vector<34x32xf32>
    %130 = tpu.matmul %129, %17, %cst_78 {dimension_numbers = #tpu.dot_dimension_numbers<[1], [0], [0], [1], [0, 0, 1, 1], [], []>} : vector<34x32xf32>, vector<32x32xf32>, vector<34x32xf32> -> vector<34x32xf32>
    %131 = vector.broadcast %19 : vector<1x32xf32> to vector<34x32xf32>
    %132 = arith.addf %130, %131 : vector<34x32xf32>
    %133 = arith.addf %3, %132 : vector<34x32xf32>
    %cst_79 = arith.constant dense<0.000000e+00> : vector<34xf32>
    %134 = vector.multi_reduction <add>, %133, %cst_79 [1] : vector<34x32xf32> to vector<34xf32>
    %135 = vector.shape_cast %134 : vector<34xf32> to vector<34x1xf32>
    %cst_80 = arith.constant 3.200000e+01 : f32
    %136 = vector.broadcast %cst_80 : f32 to vector<34x1xf32>
    %137 = arith.divf %135, %136 : vector<34x1xf32>
    %138 = vector.broadcast %137 : vector<34x1xf32> to vector<34x32xf32>
    %139 = arith.subf %133, %138 : vector<34x32xf32>
    %140 = arith.mulf %139, %139 : vector<34x32xf32>
    %cst_81 = arith.constant dense<0.000000e+00> : vector<34xf32>
    %141 = vector.multi_reduction <add>, %140, %cst_81 [1] : vector<34x32xf32> to vector<34xf32>
    %142 = vector.shape_cast %141 : vector<34xf32> to vector<34x1xf32>
    %cst_82 = arith.constant 3.200000e+01 : f32
    %143 = vector.broadcast %cst_82 : f32 to vector<34x1xf32>
    %144 = arith.divf %142, %143 : vector<34x1xf32>
    %145 = vector.broadcast %137 : vector<34x1xf32> to vector<34x32xf32>
    %146 = arith.subf %133, %145 : vector<34x32xf32>
    %cst_83 = arith.constant 9.99999974E-6 : f32
    %147 = vector.broadcast %cst_83 : f32 to vector<34x1xf32>
    %148 = arith.addf %144, %147 : vector<34x1xf32>
    %149 = math.rsqrt %148 : vector<34x1xf32>
    %150 = vector.broadcast %149 : vector<34x1xf32> to vector<34x32xf32>
    %151 = arith.mulf %146, %150 : vector<34x32xf32>
    %152 = vector.broadcast %21 : vector<1x32xf32> to vector<34x32xf32>
    %153 = arith.mulf %151, %152 : vector<34x32xf32>
    %154 = vector.broadcast %23 : vector<1x32xf32> to vector<34x32xf32>
    %155 = arith.addf %153, %154 : vector<34x32xf32>
    %cst_84 = arith.constant dense<0.000000e+00> : vector<34x64xf32>
    %156 = tpu.matmul %155, %25, %cst_84 {dimension_numbers = #tpu.dot_dimension_numbers<[1], [0], [0], [1], [0, 0, 1, 1], [], []>} : vector<34x32xf32>, vector<32x64xf32>, vector<34x64xf32> -> vector<34x64xf32>
    %157 = vector.broadcast %27 : vector<1x64xf32> to vector<34x64xf32>
    %158 = arith.addf %156, %157 : vector<34x64xf32>
    %cst_85 = arith.constant 0.000000e+00 : f32
    %159 = vector.broadcast %cst_85 : f32 to vector<34x64xf32>
    %160 = arith.maximumf %158, %159 : vector<34x64xf32>
    %cst_86 = arith.constant dense<0.000000e+00> : vector<34x32xf32>
    %161 = tpu.matmul %160, %29, %cst_86 {dimension_numbers = #tpu.dot_dimension_numbers<[1], [0], [0], [1], [0, 0, 1, 1], [], []>} : vector<34x64xf32>, vector<64x32xf32>, vector<34x32xf32> -> vector<34x32xf32>
    %162 = vector.broadcast %31 : vector<1x32xf32> to vector<34x32xf32>
    %163 = arith.addf %161, %162 : vector<34x32xf32>
    %164 = arith.addf %155, %163 : vector<34x32xf32>
    %cst_87 = arith.constant dense<0.000000e+00> : vector<34xf32>
    %165 = vector.multi_reduction <add>, %164, %cst_87 [1] : vector<34x32xf32> to vector<34xf32>
    %166 = vector.shape_cast %165 : vector<34xf32> to vector<34x1xf32>
    %cst_88 = arith.constant 3.200000e+01 : f32
    %167 = vector.broadcast %cst_88 : f32 to vector<34x1xf32>
    %168 = arith.divf %166, %167 : vector<34x1xf32>
    %169 = vector.broadcast %168 : vector<34x1xf32> to vector<34x32xf32>
    %170 = arith.subf %164, %169 : vector<34x32xf32>
    %171 = arith.mulf %170, %170 : vector<34x32xf32>
    %cst_89 = arith.constant dense<0.000000e+00> : vector<34xf32>
    %172 = vector.multi_reduction <add>, %171, %cst_89 [1] : vector<34x32xf32> to vector<34xf32>
    %173 = vector.shape_cast %172 : vector<34xf32> to vector<34x1xf32>
    %cst_90 = arith.constant 3.200000e+01 : f32
    %174 = vector.broadcast %cst_90 : f32 to vector<34x1xf32>
    %175 = arith.divf %173, %174 : vector<34x1xf32>
    %176 = vector.broadcast %168 : vector<34x1xf32> to vector<34x32xf32>
    %177 = arith.subf %164, %176 : vector<34x32xf32>
    %cst_91 = arith.constant 9.99999974E-6 : f32
    %178 = vector.broadcast %cst_91 : f32 to vector<34x1xf32>
    %179 = arith.addf %175, %178 : vector<34x1xf32>
    %180 = math.rsqrt %179 : vector<34x1xf32>
    %181 = vector.broadcast %180 : vector<34x1xf32> to vector<34x32xf32>
    %182 = arith.mulf %177, %181 : vector<34x32xf32>
    %183 = vector.broadcast %33 : vector<1x32xf32> to vector<34x32xf32>
    %184 = arith.mulf %182, %183 : vector<34x32xf32>
    %185 = vector.broadcast %35 : vector<1x32xf32> to vector<34x32xf32>
    %186 = arith.addf %184, %185 : vector<34x32xf32>
    %c0_92 = arith.constant 0 : index
    %c0_93 = arith.constant 0 : index
    %187 = vector.load %arg19[%c0_92, %c0_93] : memref<34x32xf32, #tpu.memory_space<vmem>>, vector<34x32xf32>
    tpu.vector_store %arg19[%c0_92, %c0_93], %186 {strides = array<i32>} : memref<34x32xf32, #tpu.memory_space<vmem>>, vector<34x32xf32>,
    %c1_i32_94 = arith.constant 1 : i32
    %188 = arith.cmpi eq, %arg0, %c1_i32_94 : i32
    %189 = arith.extui %188 : i1 to i32
    %c0_i32_95 = arith.constant 0 : i32
    %190 = arith.cmpi ne, %189, %c0_i32_95 : i32
    scf.if %190 {
      %c0_96 = arith.constant 0 : index
      %c0_97 = arith.constant 0 : index
      %191 = vector.load %arg19[%c0_96, %c0_97] : memref<34x32xf32, #tpu.memory_space<vmem>>, vector<34x32xf32>
      %c0_98 = arith.constant 0 : index
      %c0_99 = arith.constant 0 : index
      %192 = vector.load %arg18[%c0_98, %c0_99] : memref<34x32xf32, #tpu.memory_space<vmem>>, vector<34x32xf32>
      tpu.vector_store %arg18[%c0_98, %c0_99], %191 {strides = array<i32>} : memref<34x32xf32, #tpu.memory_space<vmem>>, vector<34x32xf32>,
    } else {
    }
    return
  }
  func.func @transform_0(%arg0: i32) -> (i32, i32) {
    %c0_i32 = arith.constant 0 : i32
    %c0_i32_0 = arith.constant 0 : i32
    %c0_i32_1 = arith.constant 0 : i32
    return %c0_i32, %c0_i32_0 : i32, i32
  }
  func.func @transform_1(%arg0: i32) -> (i32, i32, i32) {
    %c0_i32 = arith.constant 0 : i32
    %c0_i32_0 = arith.constant 0 : i32
    %c0_i32_1 = arith.constant 0 : i32
    return %arg0, %c0_i32, %c0_i32_0 : i32, i32, i32
  }
  func.func @transform_2(%arg0: i32) -> (i32, i32, i32) {
    %c0_i32 = arith.constant 0 : i32
    %c0_i32_0 = arith.constant 0 : i32
    %c0_i32_1 = arith.constant 0 : i32
    return %arg0, %c0_i32, %c0_i32_0 : i32, i32, i32
  }
  func.func @transform_3(%arg0: i32) -> (i32, i32, i32) {
    %c0_i32 = arith.constant 0 : i32
    %c0_i32_0 = arith.constant 0 : i32
    %c0_i32_1 = arith.constant 0 : i32
    return %arg0, %c0_i32, %c0_i32_0 : i32, i32, i32
  }
  func.func @transform_4(%arg0: i32) -> (i32, i32, i32) {
    %c0_i32 = arith.constant 0 : i32
    %c0_i32_0 = arith.constant 0 : i32
    %c0_i32_1 = arith.constant 0 : i32
    return %arg0, %c0_i32, %c0_i32_0 : i32, i32, i32
  }
  func.func @transform_5(%arg0: i32) -> (i32, i32, i32) {
    %c0_i32 = arith.constant 0 : i32
    %c0_i32_0 = arith.constant 0 : i32
    %c0_i32_1 = arith.constant 0 : i32
    return %arg0, %c0_i32, %c0_i32_0 : i32, i32, i32
  }
  func.func @transform_6(%arg0: i32) -> (i32, i32, i32) {
    %c0_i32 = arith.constant 0 : i32
    %c0_i32_0 = arith.constant 0 : i32
    %c0_i32_1 = arith.constant 0 : i32
    return %arg0, %c0_i32, %c0_i32_0 : i32, i32, i32
  }
  func.func @transform_7(%arg0: i32) -> (i32, i32, i32) {
    %c0_i32 = arith.constant 0 : i32
    %c0_i32_0 = arith.constant 0 : i32
    %c0_i32_1 = arith.constant 0 : i32
    return %arg0, %c0_i32, %c0_i32_0 : i32, i32, i32
  }
  func.func @transform_8(%arg0: i32) -> (i32, i32, i32) {
    %c0_i32 = arith.constant 0 : i32
    %c0_i32_0 = arith.constant 0 : i32
    %c0_i32_1 = arith.constant 0 : i32
    return %arg0, %c0_i32, %c0_i32_0 : i32, i32, i32
  }
  func.func @transform_9(%arg0: i32) -> (i32, i32, i32) {
    %c0_i32 = arith.constant 0 : i32
    %c0_i32_0 = arith.constant 0 : i32
    %c0_i32_1 = arith.constant 0 : i32
    return %arg0, %c0_i32, %c0_i32_0 : i32, i32, i32
  }
  func.func @transform_10(%arg0: i32) -> (i32, i32, i32) {
    %c0_i32 = arith.constant 0 : i32
    %c0_i32_0 = arith.constant 0 : i32
    %c0_i32_1 = arith.constant 0 : i32
    return %arg0, %c0_i32, %c0_i32_0 : i32, i32, i32
  }
  func.func @transform_11(%arg0: i32) -> (i32, i32, i32) {
    %c0_i32 = arith.constant 0 : i32
    %c0_i32_0 = arith.constant 0 : i32
    %c0_i32_1 = arith.constant 0 : i32
    return %arg0, %c0_i32, %c0_i32_0 : i32, i32, i32
  }
  func.func @transform_12(%arg0: i32) -> (i32, i32, i32) {
    %c0_i32 = arith.constant 0 : i32
    %c0_i32_0 = arith.constant 0 : i32
    %c0_i32_1 = arith.constant 0 : i32
    return %arg0, %c0_i32, %c0_i32_0 : i32, i32, i32
  }
  func.func @transform_13(%arg0: i32) -> (i32, i32, i32) {
    %c0_i32 = arith.constant 0 : i32
    %c0_i32_0 = arith.constant 0 : i32
    %c0_i32_1 = arith.constant 0 : i32
    return %arg0, %c0_i32, %c0_i32_0 : i32, i32, i32
  }
  func.func @transform_14(%arg0: i32) -> (i32, i32, i32) {
    %c0_i32 = arith.constant 0 : i32
    %c0_i32_0 = arith.constant 0 : i32
    %c0_i32_1 = arith.constant 0 : i32
    return %arg0, %c0_i32, %c0_i32_0 : i32, i32, i32
  }
  func.func @transform_15(%arg0: i32) -> (i32, i32, i32) {
    %c0_i32 = arith.constant 0 : i32
    %c0_i32_0 = arith.constant 0 : i32
    %c0_i32_1 = arith.constant 0 : i32
    return %arg0, %c0_i32, %c0_i32_0 : i32, i32, i32
  }
  func.func @transform_16(%arg0: i32) -> (i32, i32, i32) {
    %c0_i32 = arith.constant 0 : i32
    %c0_i32_0 = arith.constant 0 : i32
    %c0_i32_1 = arith.constant 0 : i32
    return %arg0, %c0_i32, %c0_i32_0 : i32, i32, i32
  }
  func.func @transform_17(%arg0: i32) -> (i32, i32) {
    %c0_i32 = arith.constant 0 : i32
    %c0_i32_0 = arith.constant 0 : i32
    %c0_i32_1 = arith.constant 0 : i32
    return %c0_i32, %c0_i32_0 : i32, i32
  }
}

module attributes {stable_mosaic.version = 11 : i64} {
  func.func @_tiled_linear_kernel(%arg0: i32, %arg1: memref<2x32xf32, #tpu.memory_space<vmem>>, %arg2: memref<32x256xf32, #tpu.memory_space<vmem>>, %arg3: memref<1x256xf32, #tpu.memory_space<vmem>>, %arg4: memref<2x256xf32, #tpu.memory_space<vmem>>) attributes {dimension_semantics = [#tpu.dimension_semantics<parallel>], iteration_bounds = array<i64: 1>, scalar_prefetch = 0 : i64, scratch_operands = 0 : i64, tpu.core_type = #tpu.core_type<tc>, window_params = [{pipeline_mode = #tpu.pipeline_mode<synchronous>, transform_indices = @transform_0, window_bounds = array<i64: 2, 32>}, {transform_indices = @transform_1, window_bounds = array<i64: 32, 256>}, {transform_indices = @transform_2, window_bounds = array<i64: 1, 256>}, {transform_indices = @transform_3, window_bounds = array<i64: 2, 256>}]} {
    %c0 = arith.constant 0 : index
    %c0_0 = arith.constant 0 : index
    %0 = vector.load %arg1[%c0, %c0_0] : memref<2x32xf32, #tpu.memory_space<vmem>>, vector<2x32xf32>
    %c0_1 = arith.constant 0 : index
    %c0_2 = arith.constant 0 : index
    %1 = vector.load %arg2[%c0_1, %c0_2] : memref<32x256xf32, #tpu.memory_space<vmem>>, vector<32x256xf32>
    %cst = arith.constant dense<0.000000e+00> : vector<2x256xf32>
    %2 = tpu.matmul %0, %1, %cst {dimension_numbers = #tpu.dot_dimension_numbers<[1], [0], [0], [1], [0, 0, 1, 1], [], []>} : vector<2x32xf32>, vector<32x256xf32>, vector<2x256xf32> -> vector<2x256xf32>
    %c0_3 = arith.constant 0 : index
    %c0_4 = arith.constant 0 : index
    %3 = vector.load %arg3[%c0_3, %c0_4] : memref<1x256xf32, #tpu.memory_space<vmem>>, vector<1x256xf32>
    %4 = vector.broadcast %3 : vector<1x256xf32> to vector<2x256xf32>
    %5 = arith.addf %2, %4 : vector<2x256xf32>
    %c0_5 = arith.constant 0 : index
    %c0_6 = arith.constant 0 : index
    %6 = vector.load %arg4[%c0_5, %c0_6] : memref<2x256xf32, #tpu.memory_space<vmem>>, vector<2x256xf32>
    tpu.vector_store %arg4[%c0_5, %c0_6], %5 {strides = array<i32>} : memref<2x256xf32, #tpu.memory_space<vmem>>, vector<2x256xf32>,
    return
  }
  func.func @transform_0(%arg0: i32) -> (i32, i32) {
    %c0_i32 = arith.constant 0 : i32
    %c0_i32_0 = arith.constant 0 : i32
    %c0_i32_1 = arith.constant 0 : i32
    return %c0_i32, %c0_i32_0 : i32, i32
  }
  func.func @transform_1(%arg0: i32) -> (i32, i32) {
    %c0_i32 = arith.constant 0 : i32
    %c0_i32_0 = arith.constant 0 : i32
    return %c0_i32, %arg0 : i32, i32
  }
  func.func @transform_2(%arg0: i32) -> (i32, i32) {
    %c0_i32 = arith.constant 0 : i32
    %c0_i32_0 = arith.constant 0 : i32
    return %c0_i32, %arg0 : i32, i32
  }
  func.func @transform_3(%arg0: i32) -> (i32, i32) {
    %c0_i32 = arith.constant 0 : i32
    %c0_i32_0 = arith.constant 0 : i32
    return %c0_i32, %arg0 : i32, i32
  }
}

</mosaic_0001>

<bundles_post_ra>
// kernel: temporal_vit_forward.6
= control target key start
LH: loop header
LB: loop body
LE: loop exit
PB: predicated region body
PF: predicated region fallthrough
CT: control target
= control target key end

     0   :  { %vm21_vm0 = vcmask 254976   ;;  %v166_v7 = vmov 0.0   ;;  %vm167_vm1 = vmmov 0   ;;  %vm63_vm2 = vcmask 261120   ;;  %s228_s0 = inlined_call_operand.vmem [shape: f32[2,32], index: 0, kind: input, shape index: {}]   ;;  %s229_s3 = inlined_call_operand.vmem [shape: f32[32,32], index: 3, kind: input, shape index: {}]   ;;  %s230_s1 = inlined_call_operand.vmem [shape: f32[1,32], index: 1, kind: input, shape index: {}]   ;;  %s231_s2 = inlined_call_operand.vmem [shape: f32[1,32], index: 2, kind: input, shape index: {}]   ;;  %s232_s4 = inlined_call_operand.vmem [shape: f32[1,32], index: 4, kind: input, shape index: {}]   ;;  %s233_s5 = inlined_call_operand.vmem [shape: f32[2,32], index: 5, kind: output, shape index: {}]  }
   0x1   :  { %v20_v0 = vld [vmem:[%s228_s0] sm:$0x3]  ;;  %151 = vmatprep.subr.mxu0 %v166_v7  ;;  %v55_v8 = vld [vmem:[%s229_s3 + $0x18] sm:$0xff]  ;;  %v54_v9 = vld [vmem:[%s229_s3 + $0x10] sm:$0xff]  ;;  %159 = vmatprep.mubr.msk.f32.mxu0 %vm167_vm1, %v166_v7 }
   0x2   :  { %v22_v1 = vsel %vm21_vm0, %v20_v0, 0.0  ;;  %152 = vmatpush3.msra.mxu0 %v55_v8  ;;  %v53_v10 = vld [vmem:[%s229_s3 + $0x8] sm:$0xff]  ;;  %v52_v11 = vld [vmem:[%s229_s3] sm:$0xff] }
   0x3   :  { %23 = vadd.xlane.f32.xlu0 %v22_v1  ;;  %153 = vmatprep.subr.mxu0 %v166_v7  ;;  %v142_v16 = vld [vmem:[%s230_s1] ss:$0 sm:$0xff] }
   0x4   :  { %154 = vmatpush3.msra.mxu0 %v54_v9  ;;  %v143_v18 = vld [vmem:[%s231_s2] ss:$0 sm:$0xff] }
   0x5   :  { %155 = vmatprep.subr.mxu0 %v166_v7  ;;  %v144_v21 = vld [vmem:[%s232_s4] ss:$0 sm:$0xff] }
   0x6   :  { %156 = vmatpush3.msra.mxu0 %v53_v10 }
   0x7   :  { %157 = vmatprep.subr.mxu0 %v166_v7 }
   0x8   :  { %158 = vmatpush3.msra.mxu0 %v52_v11 }
  0x8c   :  { %v24_v2 = vpop.xlane.xlu0 %23 }
  0x8d   :  { %v26_v3 = vmul.f32 0.03125, %v24_v2 }
  0x8f   :  { %v27_v4 = vsub.f32 %v20_v0, %v26_v3 }
  0x91   :  { %v28_v5 = vmul.f32 %v27_v4, %v27_v4 }
  0x93   :  { %v29_v6 = vsel %vm21_vm0, %v28_v5, 0.0 }
  0x94   :  { %30 = vadd.xlane.f32.xlu0 %v29_v6 }
 0x11d   :  { %v31_v12 = vpop.xlane.xlu0 %30 }
 0x11e   :  { %v32_v13 = vmul.f32 0.03125, %v31_v12 }
 0x120   :  { %v33_v14 = vadd.f32 1e-05, %v32_v13 }
 0x122   :  { %164 = vrsqrt.f32 %v33_v14 }
 0x12f   :  { %v165_v15 = vpop.eup %164 }
 0x130   :  { %v35_v17 = vmul.f32 %v165_v15, %v27_v4 }
 0x132   :  { %v43_v19 = vmul.f32 %v142_v16, %v35_v17 }
 0x134   :  { %v51_v20 = vadd.f32 %v143_v18, %v43_v19 }
 0x136   :  { %160 = vmatmul.mubr.msk.f32.vlgmr.msra.gmra.mxu0 %vm63_vm2, %v51_v20 }
 0x1f6   :  { %v133_v22 = vpop.f32.mrf.mxu0 }
 0x1f7   :  { %v134_v23 = vadd.f32 %v144_v21, %v133_v22 }
 0x1f8   :  { %v161_v24 = vpop.f32.mrf.mxu0 }
 0x1f9   :  { %137 = vst.msk [vmem:[%s233_s5] sm:$0x3] %vm21_vm0, %v134_v23 }

// kernel: temporal_vit_forward.7
= control target key start
LH: loop header
LB: loop body
LE: loop exit
PB: predicated region body
PF: predicated region fallthrough
CT: control target
= control target key end

     0   :  { %v129_v3 = vmov 0.0   ;;  %vm35_vm0 = vcmask 261120   ;;  %v25_v10 = vlaneseq  ;;  %s183_s1 = inlined_call_operand.vmem [shape: f32[32,256], index: 1, kind: input, shape index: {}]   ;;  %s184_s0 = inlined_call_operand.vmem [shape: f32[2,32], index: 0, kind: input, shape index: {}]   ;;  %s185_s2 = inlined_call_operand.vmem [shape: f32[1,256], index: 2, kind: input, shape index: {}]   ;;  %s186_s3 = inlined_call_operand.vmem [shape: f32[2,256], index: 3, kind: output, shape index: {}]  }
   0x1   :  { %v22_v0 = vld [vmem:[%s183_s1 + $0x38] sm:$0xff]  ;;  %v21_v1 = vld [vmem:[%s183_s1 + $0x30] sm:$0xff]  ;;  %v20_v2 = vld [vmem:[%s183_s1 + $0x28] sm:$0xff]  ;;  %103 = vmatprep.mubr.f32.mxu0 %v129_v3 }
   0x2   :  { %63 = vmatprep.subr.mxu0 %v22_v0  ;;  %v19_v4 = vld [vmem:[%s183_s1 + $0x20] sm:$0xff]  ;;  %v18_v5 = vld [vmem:[%s183_s1 + $0x18] sm:$0xff]  ;;  %v17_v6 = vld [vmem:[%s183_s1 + $0x10] sm:$0xff]  ;;  %v26_v11 = vshrl.u32 %v25_v10, 7 }
   0x3   :  { %64 = vmatpush1.msra.mxu0 %v21_v1  ;;  %v16_v7 = vld [vmem:[%s183_s1 + $0x8] sm:$0xff]  ;;  %v15_v8 = vld [vmem:[%s183_s1] sm:$0xff] }
   0x4   :  { %65 = vmatprep.subr.mxu0 %v20_v2  ;;  %v14_v9 = vld [vmem:[%s184_s0] sm:$0x3]  ;;  %v27_v12 = vsub.s32 0, %v26_v11  ;;  %v31_v13 = vsub.s32 1, %v26_v11 }
   0x5   :  { %66 = vmatpush1.msra.mxu0 %v19_v4  ;;  %v23_v14 = vld [vmem:[%s185_s2] sm:$0x3] }
   0x6   :  { %67 = vmatprep.subr.mxu0 %v18_v5  ;;  %v28_v15 = vrot.slane %v23_v14, %v27_v12  ;;  %v32_v16 = vrot.slane %v23_v14, %v31_v13 }
   0x7   :  { %68 = vmatpush1.msra.mxu0 %v17_v6 }
   0x8   :  { %69 = vmatprep.subr.mxu0 %v16_v7 }
   0x9   :  { %70 = vmatpush1.msra.mxu0 %v15_v8 }
   0xa   :  { %126 = vmatmul.mubr.msk.f32.vlgmr.msra.gmra.mxu0 %vm35_vm0, %v14_v9 }
  0xca   :  { %v105_v17 = vpop.f32.mrf.mxu0 }
  0xcb   :  { %v106_v19 = vadd.f32 %v105_v17, %v28_v15 }
  0xcc   :  { %v107_v18 = vpop.f32.mrf.mxu0 }
  0xcd   :  { %v108_v20 = vadd.f32 %v107_v18, %v32_v16 }
  0xcf   :  { %v112_v21 = vcombine.low %v106_v19, %v108_v20 }
  0xd1   :  { %127 = vst.sshfl [vmem:[%s186_s3] sm:$0x33 pattern:$0x76325410] %v112_v21 }

// kernel: temporal_vit_forward.4
= control target key start
LH: loop header
LB: loop body
LE: loop exit
PB: predicated region body
PF: predicated region fallthrough
CT: control target
= control target key end

     0   :  { %vm33_vm0 = vcmask 130048   ;;  %vm141_vm1 = vcmask 1046528   ;;  %vm136_vm2 = vcmask 253952   ;;  %vm151_vm3 = vcmask 261120   ;;  %s269_s1 = inlined_call_operand.vmem [shape: f32[16,32], index: 1, kind: input, shape index: {}]   ;;  %s270_s0 = inlined_call_operand.vmem [shape: f32[32,16], index: 0, kind: input, shape index: {}]   ;;  %s271_s4 = inlined_call_operand.vmem [shape: f32[17,32], index: 4, kind: input, shape index: {}]   ;;  %s272_s3 = inlined_call_operand.vmem [shape: f32[1,32], index: 3, kind: input, shape index: {}]   ;;  %s273_s5 = inlined_call_operand.vmem [shape: f32[34,32], index: 5, kind: output, shape index: {}]   ;;  %s274_s2 = inlined_call_operand.vmem [shape: f32[1,32], index: 2, kind: input, shape index: {}]  }
   0x1   :  { %v25_v0 = vld [vmem:[%s269_s1 + $0x8] sm:$0xff]  ;;  %v24_v1 = vld [vmem:[%s269_s1] sm:$0xff]  ;;  %v22_v3 = vld [vmem:[%s270_s0 + $0x10] sm:$0xff] }
   0x2   :  { %174 = vmatprep.subr.mxu0 %v25_v0  ;;  %184 = vmatprep.subr.mxu1 %v25_v0  ;;  %v20_v2 = vld [vmem:[%s270_s0] sm:$0xff]  ;;  %v21_v4 = vld [vmem:[%s270_s0 + $0x8] sm:$0xff]  ;;  %v23_v5 = vld [vmem:[%s270_s0 + $0x18] sm:$0xff] }
   0x3   :  { %175 = vmatpush3.msra.mxu0 %v25_v0  ;;  %186 = vmatpush3.msra.mxu1 %v25_v0  ;;  %v132_v6 = vld [vmem:[%s271_s4 + $0x8] sm:$0xff]  ;;  %v131_v7 = vld [vmem:[%s271_s4] sm:$0xff]  ;;  %v133_v13 = vld [vmem:[%s271_s4 + $0x10] sm:$0x1] }
   0x4   :  { %176 = vmatprep.subr.mxu0 %v24_v1  ;;  %185 = vmatprep.subr.mxu1 %v24_v1  ;;  %v143_v8 = vrot.slane %v132_v6, 1  ;;  %v142_v9 = vrot.slane %v131_v7, 1  ;;  %v134_v10 = vld [vmem:[%s272_s3] sm:$0x1]  ;;  %v145_v14 = vrot.slane %v133_v13, 1 }
   0x5   :  { %177 = vmatpush3.msra.mxu0 %v24_v1  ;;  %187 = vmatpush3.msra.mxu1 %v24_v1  ;;  %v135_v12 = vadd.f32 %v134_v10, %v131_v7  ;;  %v163_v15 = vld [vmem:[%s274_s2] ss:$0 sm:$0xff] }
   0x6   :  { %178 = vmatprep.mubr.msk.f32.mxu0 %vm33_vm0, %v20_v2  ;;  %181 = vmatprep.mubr.msk.f32.mxu1 %vm33_vm0, %v22_v3  ;;  %v144_v11 = vsel %vm141_vm1, %v142_v9, %v143_v8  ;;  %v146_v17 = vsel %vm141_vm1, %v143_v8, %v145_v14 }
   0x7   :  { %179 = vmatmul.mubr.msk.f32.vlgmr.msra.gmra.mxu0 %vm33_vm0, %v21_v4  ;;  %182 = vmatmul.mubr.msk.f32.vlgmr.msra.gmra.mxu1 %vm33_vm0, %v23_v5  ;;  %137 = vst.msk [vmem:[%s273_s5] sm:$0x1] %vm136_vm2, %v135_v12  ;;  %154 = vst.msk [vmem:[%s273_s5 + $0x11] sm:$0x1] %vm136_vm2, %v135_v12 }
  0xc7   :  { %v180_v16 = vpop.f32.mrf.mxu0  ;;  %v183_v18 = vpop.f32.mrf.mxu1 }
  0xc8   :  { %v118_v19 = vadd.f32 %v180_v16, %v163_v15  ;;  %v128_v20 = vadd.f32 %v183_v18, %v163_v15 }
  0xc9   :  { %v112_v21 = vpop.f32.mrf.mxu0  ;;  %v122_v22 = vpop.f32.mrf.mxu1 }
  0xca   :  { %v150_v23 = vadd.f32 %v146_v17, %v118_v19  ;;  %v156_v24 = vadd.f32 %v146_v17, %v128_v20  ;;  %v113_v25 = vadd.f32 %v163_v15, %v112_v21  ;;  %v123_v26 = vadd.f32 %v163_v15, %v122_v22 }
  0xcc   :  { %153 = vst.msk [vmem:[%s273_s5 + $0x9] sm:$0xff] %vm151_vm3, %v150_v23  ;;  %158 = vst.msk [vmem:[%s273_s5 + $0x1a] sm:$0xff] %vm151_vm3, %v156_v24  ;;  %v149_v27 = vadd.f32 %v144_v11, %v113_v25  ;;  %v155_v28 = vadd.f32 %v144_v11, %v123_v26 }
  0xce   :  { %152 = vst.msk [vmem:[%s273_s5 + $0x1] sm:$0xff] %vm151_vm3, %v149_v27  ;;  %157 = vst.msk [vmem:[%s273_s5 + $0x12] sm:$0xff] %vm151_vm3, %v155_v28 }

// kernel: temporal_vit_forward.5
= control target key start
LH: loop header
LB: loop body
LE: loop exit
PB: predicated region body
PF: predicated region fallthrough
CT: control target
= control target key end

     0   :  { %s3422_s24 = smov 0   ;;  %s4089_s0 = inlined_call_operand.vmem [shape: f32[34,32], index: 0, kind: input, shape index: {}]   ;;  %s4090_s1 = inlined_call_operand.vmem [shape: f32[2,32,32], index: 1, kind: input, shape index: {}]   ;;  %s4091_s2 = inlined_call_operand.vmem [shape: f32[2,1,32], index: 2, kind: input, shape index: {}]   ;;  %s4092_s3 = inlined_call_operand.vmem [shape: f32[2,32,32], index: 3, kind: input, shape index: {}]   ;;  %s4093_s4 = inlined_call_operand.vmem [shape: f32[2,1,32], index: 4, kind: input, shape index: {}]   ;;  %s4094_s5 = inlined_call_operand.vmem [shape: f32[2,32,32], index: 5, kind: input, shape index: {}]   ;;  %s4095_s6 = inlined_call_operand.vmem [shape: f32[2,1,32], index: 6, kind: input, shape index: {}]   ;;  %s4096_s7 = inlined_call_operand.vmem [shape: f32[2,32,32], index: 7, kind: input, shape index: {}]   ;;  %s4097_s8 = inlined_call_operand.vmem [shape: f32[2,1,32], index: 8, kind: input, shape index: {}]   ;;  %s4098_s9 = inlined_call_operand.vmem [shape: f32[2,1,32], index: 9, kind: input, shape index: {}]   ;;  %s4099_s10 = inlined_call_operand.vmem [shape: f32[2,1,32], index: 10, kind: input, shape index: {}]   ;;  %s4100_s11 = inlined_call_operand.vmem [shape: f32[2,32,64], index: 11, kind: input, shape index: {}]   ;;  %s4101_s12 = inlined_call_operand.vmem [shape: f32[2,1,64], index: 12, kind: input, shape index: {}]   ;;  %s4102_s13 = inlined_call_operand.vmem [shape: f32[2,64,32], index: 13, kind: input, shape index: {}]   ;;  %s4103_s14 = inlined_call_operand.vmem [shape: f32[2,1,32], index: 14, kind: input, shape index: {}]   ;;  %s4104_s15 = inlined_call_operand.vmem [shape: f32[2,1,32], index: 15, kind: input, shape index: {}]   ;;  %s4105_s16 = inlined_call_operand.vmem [shape: f32[2,1,32], index: 16, kind: input, shape index: {}]   ;;  %s4106_s17 = inlined_call_operand.vmem [shape: f32[34,32], index: 17, kind: output, shape index: {}]  }
   0x1   :  { %4112 = sst [smem:[#allocation7_spill]] %s4089_s0 }
   0x2   :  { %4113 = sst [smem:[#allocation8_spill]] %s4090_s1 }
   0x3   :  { %4114 = sst [smem:[#allocation9_spill]] %s4091_s2 }
   0x4   :  { %4115 = sst [smem:[#allocation10_spill]] %s4092_s3 }
   0x5   :  { %4116 = sst [smem:[#allocation11_spill]] %s4094_s5 }
   0x6   :  { %4117 = sst [smem:[#allocation12_spill]] %s4096_s7 }
   0x7   :  { %4118 = sst [smem:[#allocation13_spill]] %s4100_s11 }
   0x8   :  { %4119 = sst [smem:[#allocation14_spill]] %s4105_s16 }
   0x9   :  { %4120 = sst [smem:[#allocation15_spill]] %s4106_s17 }
   0xa LB: > { %4121 = sst [smem:[#allocation4_spill]] %s3327_s24  ;;  %s3428_s25 = sadd.s32 4294967295, %s3327_s24   ;;  %s3327_s24 = sphi %s3422_s24, %s27_s24  }
   0xb   : > { %4122 = sst [smem:[#allocation5_spill]] %s3428_s25  ;;  %p2779_p0 = scmp.ge.s32.totalorder %s3327_s24, 1 }
   0xc   : > { %p612_p1 = scmp.lt.s32.totalorder %s3327_s24, 3 }
   0xe   : > { %p613_p2 = pnand %p2779_p0, %p612_p1 }
  0x10   : > { %616 = sbr.rel (%p613_p2) target bundleno = 2181 (0x885), region = 88 }
  0x15   : > { %p714_p3 = scmp.lt.s32.totalorder %s3428_s25, 1  ;;  %s4124_s19 = sld [smem:[#allocation8_spill]] }
  0x16   : > { %s4125_s3 = sld [smem:[#allocation10_spill]] }
  0x17   : > { %s3434_s26 = scalar_select %p714_p3, %s3428_s25, 1 }
  0x18   : > { %s4126_s5 = sld [smem:[#allocation11_spill]] }
  0x19   : > { %s2880_s27 = sshll.u32 %s3434_s26, 5  ;;  %s4128_s7 = sld [smem:[#allocation12_spill]] }
  0x1a   : > { %s4129_s11 = sld [smem:[#allocation13_spill]]  ;;  %s767_s16 = scalar_lea.vmem %s4103_s14, %s3434_s26 }
  0x1b   : > { %s3444_s1 = scalar_lea.vmem %s4124_s19, %s2880_s27  ;;  %s4130_s17 = sld [smem:[#allocation14_spill]] }
  0x1c   : > { %s3449_s22 = scalar_lea.vmem %s4125_s3, %s2880_s27  ;;  %s4131_s18 = sld [smem:[#allocation5_spill]] }
  0x1e   : > { %s3458_s28 = scalar_lea.vmem %s4126_s5, %s2880_s27 }
  0x1f   : > { %4127 = sst [smem:[#allocation6_spill]] %s3458_s28  ;;  %s3467_s2 = scalar_lea.vmem %s4128_s7, %s2880_s27 }
  0x20   : > { %s3484_s29 = scalar_lea.vmem %s4129_s11, %s2880_s27  ;;  %s2885_s7 = sshll.u32 %s3434_s26, 6 }
  0x21   : > { %s3494_s3 = scalar_lea.vmem %s4102_s13, %s2885_s7  ;;  %s770_s28 = scalar_lea.vmem %s4104_s15, %s3434_s26 }
  0x22   : > { %s773_s11 = scalar_lea.vmem %s4130_s17, %s3434_s26  ;;  %p2792_p4 = scmp.ne.s32.totalorder %s4131_s18, 0 }
  0x23   : > { %s4132_s20 = sld [smem:[#allocation7_spill]] (!%p2792_p4) }
  0x24   : > { %777 = sbr.rel (%p2792_p4) target bundleno = 45 (0x2d), region = 92 }
  0x29   : > { %v778_v0 = vld [vmem:[%s4132_s20] sm:$0xff]  ;;  %vm783_vm0 = vcmask 261120   ;;  %v779_v1 = vld [vmem:[%s4132_s20 + $0x8] sm:$0xff]  ;;  %v780_v2 = vld [vmem:[%s4132_s20 + $0x10] sm:$0xff]  ;;  %vm788_vm1 = vcmask 254976  }
  0x2a   : > { %784 = vst.msk [vmem:[#allocation2] sm:$0xff] %vm783_vm0, %v778_v0  ;;  %785 = vst.msk [vmem:[#allocation2 + $0x8] sm:$0xff] %vm783_vm0, %v779_v1  ;;  %v781_v3 = vld [vmem:[%s4132_s20 + $0x18] sm:$0xff]  ;;  %v782_v4 = vld [vmem:[%s4132_s20 + $0x20] sm:$0x3] }
  0x2b   : > { %786 = vst.msk [vmem:[#allocation2 + $0x10] sm:$0xff] %vm783_vm0, %v780_v2  ;;  %787 = vst.msk [vmem:[#allocation2 + $0x18] sm:$0xff] %vm783_vm0, %v781_v3 }
  0x2c   : > { %789 = vst.msk [vmem:[#allocation2 + $0x20] sm:$0x3] %vm788_vm1, %v782_v4 }
  0x2d PF: > { %v798_v5 = vld [vmem:[%s3444_s1 + $0x18] sm:$0xff]  ;;  %v1142_v6 = vlaneseq  ;;  %v3329_v7 = vmov 0.0   ;;  %v797_v8 = vld [vmem:[%s3444_s1 + $0x10] sm:$0xff]  ;;  %v796_v10 = vld [vmem:[%s3444_s1 + $0x8] sm:$0xff]  ;;  %vm839_vm2 = vcmask 261120   ;;  %vm3330_vm3 = vmmov 0   ;;  %s4143_s7 = scalar_lea.vmem %s4093_s4, %s3434_s26  ;;  %s4145_s5 = scalar_lea.vmem %s4095_s6, %s3434_s26 }
  0x2e   : > { %3246 = vmatprep.subr.mxu1 %v3329_v7  ;;  %2988 = vmatprep.subr.mxu0 %v3329_v7  ;;  %v795_v11 = vld [vmem:[%s3444_s1] sm:$0xff]  ;;  %v803_v16 = vld [vmem:[%s3449_s22 + $0x18] sm:$0xff]  ;;  %v802_v17 = vld [vmem:[%s3449_s22 + $0x10] sm:$0xff]  ;;  %v3331_v27 = vmov 1.0   ;;  %s4141_s27 = sld [smem:[#allocation9_spill]]  ;;  %vm1619_vm0 = vcmask 1040384   ;;  %s4146_s25 = scalar_lea.vmem %s4097_s8, %s3434_s26 }
  0x2f   : > { %3250 = vmatpush3.msra.mxu1 %v798_v5  ;;  %2989 = vmatpush3.msra.mxu0 %v798_v5  ;;  %v3528_v9 = vand.u32 127, %v1142_v6  ;;  %v3536_v12 = vshrl.u32 %v1142_v6, 7  ;;  %v801_v23 = vld [vmem:[%s3449_s22 + $0x8] sm:$0xff]  ;;  %v800_v24 = vld [vmem:[%s3449_s22] sm:$0xff]  ;;  %vm1270_vm1 = vcmask 1046528   ;;  %s4144_s21 = sld [smem:[#allocation6_spill]]  ;;  %s4147_s1 = scalar_lea.vmem %s4098_s9, %s3434_s26 }
  0x30   : > { %3247 = vmatprep.subr.mxu1 %v3329_v7  ;;  %2990 = vmatprep.subr.mxu0 %v3329_v7  ;;  %v2799_v44 = vld [vmem:[%s4143_s7] ss:$0 sm:$0xff]  ;;  %s4149_s19 = scalar_lea.vmem %s4101_s12, %s3434_s26 }
  0x31   : > { %3251 = vmatpush3.msra.mxu1 %v797_v8  ;;  %2991 = vmatpush3.msra.mxu0 %v797_v8  ;;  %v1154_v13 = vadd.s32 1, %v3528_v9  ;;  %v3545_v15 = vld [vmem:[#allocation2] sm:$0xff]  ;;  %v1146_v18 = vadd.s32 24, %v3536_v12  ;;  %v1149_v19 = vmul.u32 8, %v3528_v9  ;;  %v3563_v22 = vld [vmem:[#allocation2 + $0x8] sm:$0xff]  ;;  %v1145_v28 = vadd.s32 16, %v3536_v12 }
  0x32   : > { %3248 = vmatprep.subr.mxu1 %v3329_v7  ;;  %2992 = vmatprep.subr.mxu0 %v3329_v7  ;;  %v3541_v14 = vld [vmem:[#allocation2 + $0x18] sm:$0xff]  ;;  %v3577_v25 = vld [vmem:[#allocation2 + $0x10] sm:$0xff]  ;;  %v1144_v30 = vadd.s32 8, %v3536_v12 }
  0x33   : > { %3252 = vmatpush3.msra.mxu1 %v796_v10  ;;  %2993 = vmatpush3.msra.mxu0 %v796_v10  ;;  %v1155_v20 = vmul.u32 8, %v1154_v13  ;;  %v3558_v21 = vld [vmem:[#allocation2 + $0x20] sm:$0x3]  ;;  %vm1153_vm4 = vcmp.ge.s32.totalorder %v1146_v18, %v1149_v19  ;;  %vm1152_vm7 = vcmp.ge.s32.totalorder %v1145_v28, %v1149_v19  ;;  %vm1150_vm13 = vcmp.ge.s32.totalorder %v3536_v12, %v1149_v19 }
  0x34   : > { %3249 = vmatprep.subr.mxu1 %v3329_v7  ;;  %2994 = vmatprep.subr.mxu0 %v3329_v7  ;;  %vm1151_vm10 = vcmp.ge.s32.totalorder %v1144_v30, %v1149_v19  ;;  %s4142_s0 = scalar_lea.vmem %s4141_s27, %s3434_s26 }
  0x35   : > { %3253 = vmatpush3.msra.mxu1 %v795_v11  ;;  %3005 = vmatprep.mubr.msk.f32.mxu1 %vm3330_vm3, %v3329_v7  ;;  %vm1159_vm5 = vcmp.lt.s32.totalorder %v1146_v18, %v1155_v20  ;;  %vm1158_vm8 = vcmp.lt.s32.totalorder %v1145_v28, %v1155_v20  ;;  %vm1157_vm11 = vcmp.lt.s32.totalorder %v1144_v30, %v1155_v20  ;;  %v2793_v33 = vld [vmem:[%s4142_s0] ss:$0 sm:$0xff]  ;;  %s4148_s0 = scalar_lea.vmem %s4099_s10, %s3434_s26 }
  0x36   : > { %2995 = vmatpush3.msra.mxu0 %v795_v11  ;;  %2996 = vmatprep.mubr.msk.f32.mxu0 %vm3330_vm3, %v3329_v7  ;;  %vm3581_vm6 = vmand %vm1153_vm4, %vm1159_vm5  ;;  %vm1156_vm14 = vcmp.lt.s32.totalorder %v3536_v12, %v1155_v20 }
  0x37   : > { %3006 = vmatmul.mubr.msk.f32.vlgmr.msra.gmra.mxu1 %vm839_vm2, %v3541_v14  ;;  %3011 = vmatprep.subr.mxu1 %v3329_v7  ;;  %vm3616_vm9 = vmand %vm1152_vm7, %vm1158_vm8  ;;  %vm1414_vm8 = vcmask 1043456  }
  0x38   : > { %2997 = vmatmul.mubr.msk.f32.vlgmr.msra.gmra.mxu0 %vm839_vm2, %v3545_v15  ;;  %3012 = vmatpush3.msra.mxu1 %v803_v16  ;;  %vm3625_vm12 = vmand %vm1151_vm10, %vm1157_vm11  ;;  %vm1404_vm10 = vcmask 31744   ;;  %vm2381_vm11 = vcmask 523264  }
  0x39   : > { %3013 = vmatprep.subr.mxu1 %v3329_v7  ;;  %3008 = vmatprep.mubr.msk.f32.mxu1 %vm3330_vm3, %v3329_v7  ;;  %vm3635_vm15 = vmand %vm1150_vm13, %vm1156_vm14 }
  0x3a   : > { %3014 = vmatpush3.msra.mxu1 %v802_v17  ;;  %2999 = vmatprep.mubr.msk.f32.mxu0 %vm3330_vm3, %v3329_v7 }
  0x3b   : > { %3009 = vmatmul.mubr.msk.f32.gmra.mxu1 %vm839_vm2, %v3558_v21  ;;  %3015 = vmatprep.subr.mxu1 %v3329_v7 }
  0x3c   : > { %3000 = vmatmul.mubr.msk.f32.gmra.mxu0 %vm839_vm2, %v3563_v22  ;;  %3016 = vmatpush3.msra.mxu1 %v801_v23 }
  0x3d   : > { %3017 = vmatprep.subr.mxu1 %v3329_v7  ;;  %3019 = vmatprep.mubr.msk.f32.mxu1 %vm3330_vm3, %v3329_v7 }
  0x3e   : > { %3018 = vmatpush3.msra.mxu1 %v800_v24  ;;  %3002 = vmatprep.mubr.msk.f32.mxu0 %vm3330_vm3, %v3329_v7 }
  0x3f   : > { %3020 = vmatmul.mubr.msk.f32.vlgmr.msra.gmra.mxu1 %vm839_vm2, %v3545_v15  ;;  %3057 = vmatprep.subr.mxu1 %v3329_v7 }
  0x40   : > { %3003 = vmatmul.mubr.msk.f32.gmra.mxu0 %vm839_vm2, %v3577_v25  ;;  %3022 = vmatprep.mubr.msk.f32.mxu1 %vm3330_vm3, %v3329_v7 }
  0x41   : > { %3058 = vmatpush3.msk.msra.mxu1 %vm3581_vm6, %v3331_v27  ;;  %3034 = vmatprep.subr.mxu0 %v3329_v7 }
  0x42   : > { %3059 = vmatprep.subr.mxu1 %v3329_v7  ;;  %3042 = vmatprep.mubr.msk.f32.mxu0 %vm3330_vm3, %v3329_v7 }
  0x43   : > { %3023 = vmatmul.mubr.msk.f32.gmra.mxu1 %vm839_vm2, %v3563_v22 }
  0x44   : > { %3025 = vmatprep.mubr.msk.f32.mxu1 %vm3330_vm3, %v3329_v7  ;;  %3060 = vmatpush3.msk.msra.mxu1 %vm3616_vm9, %v3331_v27 }
  0x45   : > { %3061 = vmatprep.subr.mxu1 %v3329_v7 }
  0x46   : > { %3062 = vmatpush3.msk.msra.mxu1 %vm3625_vm12, %v3331_v27 }
  0x47   : > { %3026 = vmatmul.mubr.msk.f32.gmra.mxu1 %vm839_vm2, %v3577_v25  ;;  %3063 = vmatprep.subr.mxu1 %v3329_v7 }
  0x48   : > { %3028 = vmatprep.mubr.msk.f32.mxu1 %vm3330_vm3, %v3329_v7  ;;  %3064 = vmatpush3.msk.msra.mxu1 %vm3635_vm15, %v3331_v27 }
  0x49   : > { %3074 = vmatprep.subr.mxu1 %v3329_v7 }
  0x4b   : > { %3029 = vmatmul.mubr.msk.f32.gmra.mxu1 %vm839_vm2, %v3541_v14 }
  0x4c   : > { %3031 = vmatprep.mubr.msk.f32.mxu1 %vm3330_vm3, %v3329_v7 }
  0x4f   : > { %3032 = vmatmul.mubr.msk.f32.gmra.mxu1 %vm839_vm2, %v3558_v21 }
  0x50   : > { %3065 = vmatprep.mubr.msk.f32.mxu1 %vm3330_vm3, %v3329_v7 }
  0xf7   : > { %v936_v34 = vpop.f32.mrf.mxu1 }
  0xf8   : > { %v937_v35 = vadd.f32 %v2793_v33, %v936_v34  ;;  %v921_v36 = vpop.f32.mrf.mxu0 }
  0xf9   : > { %v3007_v37 = vpop.f32.mrf.mxu1  ;;  %v922_v38 = vadd.f32 %v2793_v33, %v921_v36 }
  0xfa   : > { %v2998_v39 = vpop.f32.mrf.mxu0  ;;  %v948_v0 = vmul.f32 0.35355338, %v937_v35 }
  0xfb   : > { %v941_v40 = vpop.f32.mrf.mxu1  ;;  %v945_v45 = vmul.f32 0.35355338, %v922_v38 }
  0xfc   : > { %v942_v41 = vadd.f32 %v2793_v33, %v941_v40  ;;  %v926_v42 = vpop.f32.mrf.mxu0 }
  0xfd   : > { %v3010_v43 = vpop.f32.mrf.mxu1  ;;  %v927_v46 = vadd.f32 %v2793_v33, %v926_v42 }
  0xfe   : > { %v3001_v47 = vpop.f32.mrf.mxu0  ;;  %v949_v10 = vmul.f32 0.35355338, %v942_v41 }
  0xff   : > { %v1022_v48 = vpop.f32.mrf.mxu1  ;;  %v3653_v53 = vmul.f32 0.35355338, %v927_v46 }
 0x100   : > { %v1023_v49 = vadd.f32 %v2799_v44, %v1022_v48  ;;  %v931_v50 = vpop.f32.mrf.mxu0 }
 0x101   : > { %v932_v51 = vadd.f32 %v2793_v33, %v931_v50  ;;  %v3021_v52 = vpop.f32.mrf.mxu1  ;;  %v808_v50 = vld [vmem:[%s4144_s21 + $0x18] sm:$0xff] }
 0x102   : > { %v1175_v54 = vmul.f32 %v1023_v49, %v945_v45  ;;  %v1620_v55 = vrot.slane %v1023_v49, 7  ;;  %v3004_v56 = vpop.f32.mrf.mxu0  ;;  %3035 = vmatpush3.msra.mxu0 %v808_v50  ;;  %v806_v52 = vld [vmem:[%s4144_s21 + $0x8] sm:$0xff] }
 0x103   : > { %v3655_v57 = vmul.f32 0.35355338, %v932_v51  ;;  %v1027_v58 = vpop.f32.mrf.mxu1  ;;  %3036 = vmatprep.subr.mxu0 %v3329_v7  ;;  %v807_v51 = vld [vmem:[%s4144_s21 + $0x10] sm:$0xff] }
 0x104   : > { %v1028_v59 = vadd.f32 %v2799_v44, %v1027_v58  ;;  %3066 = vmatmul.mubr.msk.f32.vlgmr.msra.gmra.mxu1 %vm839_vm2, %v1175_v54  ;;  %3037 = vmatpush3.msra.mxu0 %v807_v51  ;;  %v1170_v54 = vadd.s32 1, %v3536_v12 }
 0x105   : > { %v1628_v60 = vmul.f32 %v1620_v55, %v3655_v57  ;;  %v3024_v61 = vpop.f32.mrf.mxu1  ;;  %3068 = vmatprep.mubr.msk.f32.mxu1 %vm3330_vm3, %v3329_v7  ;;  %3075 = vmatpush3.msk.msra.mxu1 %vm3581_vm6, %v3331_v27 }
 0x106   : > { %v1176_v62 = vmul.f32 %v1028_v59, %v3653_v53  ;;  %v1621_v63 = vrot.slane %v1028_v59, 7  ;;  %3076 = vmatprep.subr.mxu1 %v3329_v7  ;;  %3038 = vmatprep.subr.mxu0 %v3329_v7  ;;  %v1171_v56 = vmul.u32 8, %v1170_v54 }
 0x107   : > { %v1032_v1 = vpop.f32.mrf.mxu1  ;;  %3077 = vmatpush3.msk.msra.mxu1 %vm3616_vm9, %v3331_v27  ;;  %v1634_v11 = vrot.slane %v1628_v60, 1  ;;  %3039 = vmatpush3.msra.mxu0 %v806_v52 }
 0x108   : > { %v1622_v2 = vsel %vm1619_vm0, %v1620_v55, %v1621_v63  ;;  %v1033_v3 = vadd.f32 %v2799_v44, %v1032_v1  ;;  %3069 = vmatmul.mubr.msk.f32.gmra.mxu1 %vm839_vm2, %v1176_v62  ;;  %3078 = vmatprep.subr.mxu1 %v3329_v7  ;;  %v1168_v55 = vmul.u32 8, %v3536_v12  ;;  %vm1172_vm5 = vcmp.lt.s32.totalorder %v3528_v9, %v1171_v56 }
 0x109   : > { %v1629_v4 = vmul.f32 %v1622_v2, %v948_v0  ;;  %v3027_v5 = vpop.f32.mrf.mxu1  ;;  %3071 = vmatprep.mubr.msk.f32.mxu1 %vm3330_vm3, %v3329_v7  ;;  %3079 = vmatpush3.msk.msra.mxu1 %vm3625_vm12, %v3331_v27 }
 0x10a   : > { %v1177_v6 = vmul.f32 %v1033_v3, %v3655_v57  ;;  %v1623_v8 = vrot.slane %v1033_v3, 7  ;;  %3080 = vmatprep.subr.mxu1 %v3329_v7  ;;  %v1271_v24 = vrot.slane %v1033_v3, 1  ;;  %3040 = vmatprep.subr.mxu0 %v3329_v7  ;;  %vm1169_vm4 = vcmp.ge.s32.totalorder %v3528_v9, %v1168_v55 }
 0x10b   : > { %v1635_v13 = vrot.slane %v1629_v4, 1  ;;  %v1037_v16 = vpop.f32.mrf.mxu1  ;;  %3081 = vmatpush3.msk.msra.mxu1 %vm3635_vm15, %v3331_v27  ;;  %vm1173_vm7 = vmand %vm1169_vm4, %vm1172_vm5 }
 0x10c   : > { %v1038_v17 = vadd.f32 %v2799_v44, %v1037_v16  ;;  %3072 = vmatmul.mubr.msk.f32.gmra.mxu1 %vm839_vm2, %v1177_v6  ;;  %3102 = vmatprep.subr.mxu1 %v3329_v7  ;;  %v1624_v18 = vsel %vm1619_vm0, %v1621_v63, %v1623_v8  ;;  %v1729_v35 = vrot.slane %v1177_v6, 1 }
 0x10d   : > { %v3030_v19 = vpop.f32.mrf.mxu1  ;;  %3082 = vmatprep.mubr.msk.f32.mxu1 %vm3330_vm3, %v3329_v7  ;;  %v3688_v20 = vsel %vm1270_vm1, %v1634_v11, %v1635_v13  ;;  %v3690_v23 = vmul.f32 %v1624_v18, %v949_v10 }
 0x10e   : > { %v1272_v28 = vrot.slane %v1038_v17, 1  ;;  %v1725_v30 = vmul.f32 %v1038_v17, %v948_v0 }
 0x10f   : > { %v1042_v33 = vpop.f32.mrf.mxu1  ;;  %v1637_v34 = vrot.slane %v3690_v23, 1 }
 0x110   : > { %v1273_v36 = vsel %vm1270_vm1, %v1271_v24, %v1272_v28  ;;  %v1730_v37 = vrot.slane %v1725_v30, 1  ;;  %v1043_v38 = vadd.f32 %v2799_v44, %v1042_v33 }
 0x111   : > { %v1279_v39 = vmul.f32 %v1273_v36, %v945_v45  ;;  %v3033_v40 = vpop.f32.mrf.mxu1  ;;  %v3697_v41 = vsel %vm1270_vm1, %v1635_v13, %v1637_v34 }
 0x112   : > { %v3700_v42 = vsel %vm1270_vm1, %v1729_v35, %v1730_v37  ;;  %v1274_v43 = vrot.slane %v1043_v38, 1  ;;  %v3702_v46 = vmul.f32 %v1043_v38, %v949_v10 }
 0x113   : > { %3083 = vmatmul.mubr.msk.f32.vlgmr.msra.gmra.mxu1 %vm839_vm2, %v1279_v39 }
 0x114   : > { %v1275_v47 = vsel %vm1270_vm1, %v1272_v28, %v1274_v43  ;;  %v1732_v44 = vrot.slane %v3702_v46, 1  ;;  %3085 = vmatprep.mubr.msk.f32.mxu1 %vm3330_vm3, %v3329_v7  ;;  %v1281_v49 = vmul.f32 %v1274_v43, %v3655_v57  ;;  %v3755_v57 = vsel %vm1173_vm7, 1.0, %v3329_v7  ;;  %v2805_v46 = vld [vmem:[%s4145_s5] ss:$0 sm:$0xff] }
 0x115   : > { %v1280_v45 = vmul.f32 %v1275_v47, %v3653_v53  ;;  %v805_v53 = vld [vmem:[%s4144_s21] sm:$0xff]  ;;  %3103 = vmatpush3.msk.msra.mxu1 %vm1414_vm8, %v3755_v57 }
 0x116   : > { %v3713_v48 = vsel %vm1270_vm1, %v1730_v37, %v1732_v44  ;;  %3041 = vmatpush3.msra.mxu0 %v805_v53  ;;  %3130 = vmatprep.subr.mxu1 %v3329_v7 }
 0x117   : > { %3086 = vmatmul.mubr.msk.f32.gmra.mxu1 %vm839_vm2, %v1280_v45  ;;  %3043 = vmatmul.mubr.msk.f32.vlgmr.msra.gmra.mxu0 %vm839_vm2, %v3545_v15 }
 0x118   : > { %3088 = vmatprep.mubr.msk.f32.mxu1 %vm3330_vm3, %v3329_v7  ;;  %3091 = vmatprep.subr.mxu0 %v3329_v7 }
 0x119   : > { %3045 = vmatprep.mubr.msk.f32.mxu0 %vm3330_vm3, %v3329_v7  ;;  %3092 = vmatpush3.msk.msra.mxu0 %vm1414_vm8, %v3755_v57 }
 0x11a   : > { %3113 = vmatprep.subr.mxu0 %v3329_v7 }
 0x11b   : > { %3089 = vmatmul.mubr.msk.f32.gmra.mxu1 %vm839_vm2, %v1281_v49  ;;  %3046 = vmatmul.mubr.msk.f32.gmra.mxu0 %vm839_vm2, %v3563_v22 }
 0x11c   : > { %3104 = vmatprep.mubr.msk.f32.mxu1 %vm3330_vm3, %v3329_v7  ;;  %3048 = vmatprep.mubr.msk.f32.mxu0 %vm3330_vm3, %v3329_v7 }
 0x11f   : > { %3049 = vmatmul.mubr.msk.f32.gmra.mxu0 %vm839_vm2, %v3577_v25 }
 0x120   : > { %3051 = vmatprep.mubr.msk.f32.mxu0 %vm3330_vm3, %v3329_v7 }
 0x123   : > { %3052 = vmatmul.mubr.msk.f32.gmra.mxu0 %vm839_vm2, %v3541_v14 }
 0x124   : > { %3054 = vmatprep.mubr.msk.f32.mxu0 %vm3330_vm3, %v3329_v7 }
 0x127   : > { %3055 = vmatmul.mubr.msk.f32.gmra.mxu0 %vm839_vm2, %v3558_v21 }
 0x128   : > { %3093 = vmatprep.mubr.msk.f32.mxu0 %vm3330_vm3, %v3329_v7 }
 0x1c4   : > { %v1253_v12 = vpop.f32.mrf.mxu1 }
 0x1c6   : > { %v3067_v58 = vpop.f32.mrf.mxu1 }
 0x1c8   : > { %v1258_v59 = vpop.f32.mrf.mxu1 }
 0x1ca   : > { %v3070_v60 = vpop.f32.mrf.mxu1 }
 0x1cc   : > { %v1263_v9 = vpop.f32.mrf.mxu1 }
 0x1ce   : > { %v3073_v61 = vpop.f32.mrf.mxu1 }
 0x1d3   : > { %v1357_v62 = vpop.f32.mrf.mxu1 }
 0x1d4   : > { %v1371_v63 = vmax.f32 %v1253_v12, %v1357_v62 }
 0x1d5   : > { %v3084_v0 = vpop.f32.mrf.mxu1 }
 0x1d6   : > { %v1374_v1 = vsub.f32 %v1253_v12, %v1371_v63  ;;  %v1383_v2 = vsub.f32 %v1357_v62, %v1371_v63 }
 0x1d7   : > { %v1362_v3 = vpop.f32.mrf.mxu1 }
 0x1d8   : > { %v1377_v4 = vmul.f32 1.442695, %v1374_v1  ;;  %v1386_v5 = vmul.f32 1.442695, %v1383_v2  ;;  %v1372_v6 = vmax.f32 %v1258_v59, %v1362_v3 }
 0x1d9   : > { %v3087_v8 = vpop.f32.mrf.mxu1 }
 0x1da   : > { %3265 = vpow2.f32 %v1377_v4  ;;  %v1375_v10 = vsub.f32 %v1258_v59, %v1372_v6  ;;  %v1384_v11 = vsub.f32 %v1362_v3, %v1372_v6 }
 0x1db   : > { %3267 = vpow2.f32 %v1386_v5  ;;  %v1367_v13 = vpop.f32.mrf.mxu1 }
 0x1dc   : > { %v1379_v16 = vmul.f32 1.442695, %v1375_v10  ;;  %v1388_v17 = vmul.f32 1.442695, %v1384_v11  ;;  %v1373_v18 = vmax.f32 %v1263_v9, %v1367_v13 }
 0x1dd   : > { %v3090_v19 = vpop.f32.mrf.mxu1 }
 0x1de   : > { %3269 = vpow2.f32 %v1379_v16  ;;  %v1376_v24 = vsub.f32 %v1263_v9, %v1373_v18  ;;  %v1385_v28 = vsub.f32 %v1367_v13, %v1373_v18 }
 0x1df   : > { %3271 = vpow2.f32 %v1388_v17 }
 0x1e0   : > { %v1381_v30 = vmul.f32 1.442695, %v1376_v24  ;;  %v1390_v33 = vmul.f32 1.442695, %v1385_v28 }
 0x1e2   : > { %3273 = vpow2.f32 %v1381_v30 }
 0x1e3   : > { %3275 = vpow2.f32 %v1390_v33 }
 0x1e7   : > { %v3266_v35 = vpop.eup %3265 }
 0x1e8   : > { %v3268_v36 = vpop.eup %3267 }
 0x1e9   : > { %v1392_v37 = vadd.f32 %v3268_v36, %v3266_v35 }
 0x1eb   : > { %v3270_v38 = vpop.eup %3269  ;;  %3277 = vrcp.f32 %v1392_v37 }
 0x1ec   : > { %v3272_v39 = vpop.eup %3271 }
 0x1ed   : > { %v1393_v40 = vadd.f32 %v3272_v39, %v3270_v38 }
 0x1ef   : > { %v3274_v43 = vpop.eup %3273  ;;  %3279 = vrcp.f32 %v1393_v40 }
 0x1f0   : > { %v3276_v47 = vpop.eup %3275 }
 0x1f1   : > { %v1394_v45 = vadd.f32 %v3276_v47, %v3274_v43 }
 0x1f3   : > { %3281 = vrcp.f32 %v1394_v45 }
 0x1f8   : > { %v3278_v49 = vpop.eup %3277 }
 0x1f9   : > { %v1504_v50 = vmul.f32 %v3278_v49, %v3268_v36  ;;  %v1401_v51 = vmul.f32 %v3278_v49, %v3266_v35 }
 0x1fb   : > { %3094 = vmatmul.mubr.msk.f32.vlgmr.msra.gmra.mxu0 %vm1404_vm10, %v1401_v51  ;;  %3105 = vmatmul.mubr.msk.f32.vlgmr.msra.gmra.mxu1 %vm1404_vm10, %v1504_v50 }
 0x1fc   : > { %v3280_v52 = vpop.eup %3279  ;;  %3114 = vmatpush3.msk.msra.mxu0 %vm3581_vm6, %v3331_v27  ;;  %3131 = vmatpush3.msk.msra.mxu1 %vm3581_vm6, %v3331_v27  ;;  %vm1615_vm6 = vcmask 253952  }
 0x1fd   : > { %3096 = vmatprep.mubr.msk.f32.mxu0 %vm3330_vm3, %v3329_v7  ;;  %3107 = vmatprep.mubr.msk.f32.mxu1 %vm3330_vm3, %v3329_v7  ;;  %v1402_v53 = vmul.f32 %v3280_v52, %v3270_v38  ;;  %v1505_v54 = vmul.f32 %v3280_v52, %v3272_v39 }
 0x1fe   : > { %3115 = vmatprep.subr.mxu0 %v3329_v7  ;;  %3132 = vmatprep.subr.mxu1 %v3329_v7 }
 0x1ff   : > { %3097 = vmatmul.mubr.msk.f32.gmra.mxu0 %vm1404_vm10, %v1402_v53  ;;  %3108 = vmatmul.mubr.msk.f32.gmra.mxu1 %vm1404_vm10, %v1505_v54 }
 0x200   : > { %v3282_v55 = vpop.eup %3281  ;;  %3116 = vmatpush3.msk.msra.mxu0 %vm3616_vm9, %v3331_v27  ;;  %3133 = vmatpush3.msk.msra.mxu1 %vm3616_vm9, %v3331_v27  ;;  %vm2182_vm9 = vcmask 254976  }
 0x201   : > { %3117 = vmatprep.subr.mxu0 %v3329_v7  ;;  %3134 = vmatprep.subr.mxu1 %v3329_v7  ;;  %v1403_v26 = vmul.f32 %v3282_v55, %v3274_v43  ;;  %v1506_v56 = vmul.f32 %v3282_v55, %v3276_v47 }
 0x202   : > { %3099 = vmatprep.mubr.msk.f32.mxu0 %vm3330_vm3, %v3329_v7  ;;  %3110 = vmatprep.mubr.msk.f32.mxu1 %vm3330_vm3, %v3329_v7 }
 0x203   : > { %3118 = vmatpush3.msk.msra.mxu0 %vm3625_vm12, %v3331_v27  ;;  %3135 = vmatpush3.msk.msra.mxu1 %vm3625_vm12, %v3331_v27 }
 0x204   : > { %3100 = vmatmul.mubr.msk.f32.gmra.mxu0 %vm1404_vm10, %v1403_v26  ;;  %3111 = vmatmul.mubr.msk.f32.gmra.mxu1 %vm1404_vm10, %v1506_v56 }
 0x205   : > { %3119 = vmatprep.subr.mxu0 %v3329_v7  ;;  %3136 = vmatprep.subr.mxu1 %v3329_v7 }
 0x206   : > { %3120 = vmatpush3.msk.msra.mxu0 %vm3635_vm15, %v3331_v27  ;;  %3137 = vmatpush3.msk.msra.mxu1 %vm3635_vm15, %v3331_v27  ;;  %v1118_v27 = vpop.f32.mrf.mxu0 }
 0x207   : > { %3121 = vmatprep.mubr.msk.f32.mxu0 %vm3330_vm3, %v3329_v7  ;;  %3138 = vmatprep.mubr.msk.f32.mxu1 %vm3330_vm3, %v3329_v7  ;;  %v3853_v60 = vadd.f32 %v2805_v46, %v1118_v27 }
 0x208   : > { %3122 = vmatmul.mubr.msk.f32.vlgmr.msra.gmra.mxu0 %vm839_vm2, %v3688_v20  ;;  %3139 = vmatmul.mubr.msk.f32.vlgmr.msra.gmra.mxu1 %vm839_vm2, %v3700_v42  ;;  %v3044_v29 = vpop.f32.mrf.mxu0 }
 0x209   : > { %3124 = vmatprep.mubr.msk.f32.mxu0 %vm3330_vm3, %v3329_v7  ;;  %3141 = vmatprep.mubr.msk.f32.mxu1 %vm3330_vm3, %v3329_v7 }
 0x20a   : > { %3147 = vmatprep.subr.mxu0 %v3329_v7  ;;  %3158 = vmatprep.subr.mxu1 %v3329_v7  ;;  %v1123_v31 = vpop.f32.mrf.mxu0 }
 0x20b   : > { %3148 = vmatpush3.msk.msra.mxu0 %vm1414_vm8, %v3755_v57  ;;  %3159 = vmatpush3.msk.msra.mxu1 %vm1414_vm8, %v3755_v57  ;;  %v3862_v4 = vadd.f32 %v2805_v46, %v1123_v31 }
 0x20c   : > { %3125 = vmatmul.mubr.msk.f32.gmra.mxu0 %vm839_vm2, %v3697_v41  ;;  %3142 = vmatmul.mubr.msk.f32.gmra.mxu1 %vm839_vm2, %v3713_v48  ;;  %v3047_v32 = vpop.f32.mrf.mxu0 }
 0x20d   : > { %3127 = vmatprep.mubr.msk.f32.mxu0 %vm3330_vm3, %v3329_v7  ;;  %3144 = vmatprep.mubr.msk.f32.mxu1 %vm3330_vm3, %v3329_v7 }
 0x20e   : > { %3169 = vmatprep.subr.mxu0 %v3329_v7  ;;  %3192 = vmatprep.subr.mxu1 %v3329_v7  ;;  %v1128_v20 = vpop.f32.mrf.mxu0 }
 0x210   : > { %3128 = vmatmul.mubr.msk.f32.gmra.mxu0 %vm839_vm2, %v1637_v34  ;;  %3145 = vmatmul.mubr.msk.f32.gmra.mxu1 %vm839_vm2, %v1732_v44  ;;  %v3050_v41 = vpop.f32.mrf.mxu0  ;;  %v3850_v44 = vadd.f32 %v2805_v46, %v1128_v20 }
 0x211   : > { %3149 = vmatprep.mubr.msk.f32.mxu0 %vm3330_vm3, %v3329_v7  ;;  %3160 = vmatprep.mubr.msk.f32.mxu1 %vm3330_vm3, %v3329_v7 }
 0x212   : > { %v1133_v42 = vpop.f32.mrf.mxu0  ;;  %v1599_v12 = vrot.slane %v3850_v44, 1 }
 0x213   : > { %v1134_v57 = vadd.f32 %v2805_v46, %v1133_v42 }
 0x214   : > { %v3053_v23 = vpop.f32.mrf.mxu0 }
 0x215   : > { %v1600_v58 = vrot.slane %v1134_v57, 1 }
 0x216   : > { %v1138_v48 = vpop.f32.mrf.mxu0 }
 0x217   : > { %v1139_v59 = vadd.f32 %v2805_v46, %v1138_v48  ;;  %v3858_v63 = vsel %vm1270_vm1, %v1599_v12, %v1600_v58 }
 0x218   : > { %v3056_v34 = vpop.f32.mrf.mxu0 }
 0x219   : > { %v3855_v9 = vrot.slane %v1139_v59, 1 }
 0x21b   : > { %v3866_v10 = vsel %vm1270_vm1, %v1600_v58, %v3855_v9 }
 0x2bb   : > { %v1484_v61 = vpop.f32.mrf.mxu0  ;;  %v1582_v62 = vpop.f32.mrf.mxu1 }
 0x2bc   : > { %v1498_v0 = vmul.f32 %v1484_v61, %v3853_v60  ;;  %v1607_v1 = vmul.f32 %v3858_v63, %v1582_v62 }
 0x2bd   : > { %v3095_v2 = vpop.f32.mrf.mxu0  ;;  %v3106_v3 = vpop.f32.mrf.mxu1 }
 0x2be   : > { %v1610_v5 = vadd.f32 %v1607_v1, %v1498_v0 }
 0x2bf   : > { %v1489_v6 = vpop.f32.mrf.mxu0  ;;  %v1587_v8 = vpop.f32.mrf.mxu1 }
 0x2c0   : > { %1613 = vst.msk [vmem:[#allocation3] sm:$0xff] %vm839_vm2, %v1610_v5  ;;  %v1499_v11 = vmul.f32 %v1489_v6, %v3862_v4  ;;  %v1608_v13 = vmul.f32 %v3866_v10, %v1587_v8  ;;  %v813_v8 = vld [vmem:[%s3467_s2 + $0x18] sm:$0xff] }
 0x2c1   : > { %v3098_v16 = vpop.f32.mrf.mxu0  ;;  %v3109_v17 = vpop.f32.mrf.mxu1 }
 0x2c2   : > { %v1611_v18 = vadd.f32 %v1608_v13, %v1499_v11  ;;  %v812_v17 = vld [vmem:[%s3467_s2 + $0x10] sm:$0xff] }
 0x2c4   : > { %1614 = vst.msk [vmem:[#allocation3 + $0x8] sm:$0xff] %vm839_vm2, %v1611_v18  ;;  %v1494_v19 = vpop.f32.mrf.mxu0  ;;  %v1592_v24 = vpop.f32.mrf.mxu1 }
 0x2c5   : > { %v1500_v28 = vmul.f32 %v1494_v19, %v3850_v44  ;;  %v1609_v30 = vmul.f32 %v3855_v9, %v1592_v24 }
 0x2c6   : > { %v3101_v33 = vpop.f32.mrf.mxu0  ;;  %v3112_v35 = vpop.f32.mrf.mxu1 }
 0x2c7   : > { %v1612_v36 = vadd.f32 %v1609_v30, %v1500_v28  ;;  %v811_v28 = vld [vmem:[%s3467_s2 + $0x8] sm:$0xff]  ;;  %v810_v30 = vld [vmem:[%s3467_s2] sm:$0xff] }
 0x2c8   : > { %v1711_v37 = vpop.f32.mrf.mxu0  ;;  %v1806_v38 = vpop.f32.mrf.mxu1  ;;  %v2049_v33 = vld [vmem:[#allocation3] sm:$0xff] }
 0x2c9   : > { %1616 = vst.msk [vmem:[#allocation3 + $0x10] sm:$0x1] %vm1615_vm6, %v1612_v36  ;;  %v1820_v39 = vmax.f32 %v1711_v37, %v1806_v38 }
 0x2ca   : > { %v3123_v40 = vpop.f32.mrf.mxu0  ;;  %v3140_v43 = vpop.f32.mrf.mxu1 }
 0x2cb   : > { %v1823_v47 = vsub.f32 %v1711_v37, %v1820_v39  ;;  %v1832_v45 = vsub.f32 %v1806_v38, %v1820_v39  ;;  %v2050_v35 = vld [vmem:[#allocation3 + $0x8] sm:$0xff] }
 0x2cc   : > { %v1716_v49 = vpop.f32.mrf.mxu0  ;;  %v1811_v50 = vpop.f32.mrf.mxu1 }
 0x2cd   : > { %v1826_v51 = vmul.f32 1.442695, %v1823_v47  ;;  %v1835_v52 = vmul.f32 1.442695, %v1832_v45  ;;  %v1821_v53 = vmax.f32 %v1716_v49, %v1811_v50 }
 0x2ce   : > { %v3126_v54 = vpop.f32.mrf.mxu0  ;;  %v3143_v55 = vpop.f32.mrf.mxu1 }
 0x2cf   : > { %3283 = vpow2.f32 %v1826_v51  ;;  %v1824_v26 = vsub.f32 %v1716_v49, %v1821_v53  ;;  %v1833_v56 = vsub.f32 %v1811_v50, %v1821_v53 }
 0x2d0   : > { %3285 = vpow2.f32 %v1835_v52  ;;  %v1721_v27 = vpop.f32.mrf.mxu0  ;;  %v1816_v29 = vpop.f32.mrf.mxu1 }
 0x2d1   : > { %v1828_v31 = vmul.f32 1.442695, %v1824_v26  ;;  %v1837_v32 = vmul.f32 1.442695, %v1833_v56  ;;  %v1822_v20 = vmax.f32 %v1721_v27, %v1816_v29 }
 0x2d2   : > { %v3129_v41 = vpop.f32.mrf.mxu0  ;;  %v3146_v42 = vpop.f32.mrf.mxu1 }
 0x2d3   : > { %3287 = vpow2.f32 %v1828_v31  ;;  %v1825_v23 = vsub.f32 %v1721_v27, %v1822_v20  ;;  %v1834_v48 = vsub.f32 %v1816_v29, %v1822_v20 }
 0x2d4   : > { %3289 = vpow2.f32 %v1837_v32 }
 0x2d5   : > { %v1830_v34 = vmul.f32 1.442695, %v1825_v23  ;;  %v1839_v46 = vmul.f32 1.442695, %v1834_v48 }
 0x2d7   : > { %3291 = vpow2.f32 %v1830_v34 }
 0x2d8   : > { %3293 = vpow2.f32 %v1839_v46 }
 0x2dc   : > { %v3284_v57 = vpop.eup %3283 }
 0x2dd   : > { %v3286_v12 = vpop.eup %3285 }
 0x2de   : > { %v1841_v58 = vadd.f32 %v3286_v12, %v3284_v57 }
 0x2e0   : > { %v3288_v59 = vpop.eup %3287  ;;  %3295 = vrcp.f32 %v1841_v58 }
 0x2e1   : > { %v3290_v61 = vpop.eup %3289 }
 0x2e2   : > { %v1842_v62 = vadd.f32 %v3290_v61, %v3288_v59 }
 0x2e4   : > { %v3292_v0 = vpop.eup %3291  ;;  %3297 = vrcp.f32 %v1842_v62 }
 0x2e5   : > { %v3294_v1 = vpop.eup %3293 }
 0x2e6   : > { %v1843_v2 = vadd.f32 %v3294_v1, %v3292_v0 }
 0x2e8   : > { %3299 = vrcp.f32 %v1843_v2 }
 0x2ed   : > { %v3296_v3 = vpop.eup %3295 }
 0x2ee   : > { %v1948_v5 = vmul.f32 %v3296_v3, %v3286_v12  ;;  %v1850_v6 = vmul.f32 %v3296_v3, %v3284_v57 }
 0x2f0   : > { %3150 = vmatmul.mubr.msk.f32.vlgmr.msra.gmra.mxu0 %vm1404_vm10, %v1850_v6  ;;  %3161 = vmatmul.mubr.msk.f32.vlgmr.msra.gmra.mxu1 %vm1404_vm10, %v1948_v5 }
 0x2f1   : > { %v3298_v11 = vpop.eup %3297  ;;  %3152 = vmatprep.mubr.msk.f32.mxu0 %vm3330_vm3, %v3329_v7  ;;  %3163 = vmatprep.mubr.msk.f32.mxu1 %vm3330_vm3, %v3329_v7 }
 0x2f2   : > { %v1851_v13 = vmul.f32 %v3298_v11, %v3288_v59  ;;  %v1949_v16 = vmul.f32 %v3298_v11, %v3290_v61  ;;  %3170 = vmatpush3.msra.mxu0 %v813_v8 }
 0x2f3   : > { %3171 = vmatprep.subr.mxu0 %v3329_v7 }
 0x2f4   : > { %3153 = vmatmul.mubr.msk.f32.gmra.mxu0 %vm1404_vm10, %v1851_v13  ;;  %3164 = vmatmul.mubr.msk.f32.gmra.mxu1 %vm1404_vm10, %v1949_v16 }
 0x2f5   : > { %v3300_v18 = vpop.eup %3299  ;;  %3155 = vmatprep.mubr.msk.f32.mxu0 %vm3330_vm3, %v3329_v7  ;;  %3166 = vmatprep.mubr.msk.f32.mxu1 %vm3330_vm3, %v3329_v7 }
 0x2f6   : > { %3172 = vmatpush3.msra.mxu0 %v812_v17  ;;  %v1852_v19 = vmul.f32 %v3300_v18, %v3292_v0  ;;  %v1950_v24 = vmul.f32 %v3300_v18, %v3294_v1 }
 0x2f7   : > { %3173 = vmatprep.subr.mxu0 %v3329_v7 }
 0x2f8   : > { %3156 = vmatmul.mubr.msk.f32.gmra.mxu0 %vm1404_vm10, %v1852_v19  ;;  %3167 = vmatmul.mubr.msk.f32.gmra.mxu1 %vm1404_vm10, %v1950_v24 }
 0x2f9   : > { %3174 = vmatpush3.msra.mxu0 %v811_v28  ;;  %3177 = vmatprep.mubr.msk.f32.mxu0 %vm3330_vm3, %v3329_v7 }
 0x2fa   : > { %3175 = vmatprep.subr.mxu0 %v3329_v7  ;;  %3200 = vmatprep.mubr.msk.f32.mxu1 %vm3330_vm3, %v3329_v7 }
 0x2fb   : > { %3176 = vmatpush3.msra.mxu0 %v810_v30 }
 0x2fc   : > { %3178 = vmatmul.mubr.msk.f32.vlgmr.msra.gmra.mxu0 %vm839_vm2, %v2049_v33  ;;  %3215 = vmatprep.subr.mxu0 %v3329_v7  ;;  %v820_v33 = vld [vmem:[%s3484_s29 + $0x18] sm:$0xff] }
 0x2fd   : > { %3180 = vmatprep.mubr.msk.f32.mxu0 %vm3330_vm3, %v3329_v7  ;;  %3193 = vmatpush3.msra.mxu1 %v820_v33 }
 0x2fe   : > { %3194 = vmatprep.subr.mxu1 %v3329_v7 }
 0x300   : > { %3181 = vmatmul.mubr.msk.f32.gmra.mxu0 %vm839_vm2, %v2050_v35  ;;  %v819_v35 = vld [vmem:[%s3484_s29 + $0x10] sm:$0xff] }
 0x301   : > { %3183 = vmatprep.mubr.msk.f32.mxu0 %vm3330_vm3, %v3329_v7  ;;  %3195 = vmatpush3.msra.mxu1 %v819_v35  ;;  %v2863_v35 = vld [vmem:[%s4149_s19] ss:$0 sm:$0xff] }
 0x302   : > { %3196 = vmatprep.subr.mxu1 %v3329_v7 }
 0x3b0   : > { %v1928_v36 = vpop.f32.mrf.mxu0  ;;  %v2026_v37 = vpop.f32.mrf.mxu1 }
 0x3b1   : > { %v1942_v38 = vmul.f32 %v1928_v36, %v3853_v60  ;;  %v2040_v39 = vmul.f32 %v2026_v37, %v3858_v63  ;;  %v818_v36 = vld [vmem:[%s3484_s29 + $0x8] sm:$0xff] }
 0x3b2   : > { %v3151_v40 = vpop.f32.mrf.mxu0  ;;  %v3162_v43 = vpop.f32.mrf.mxu1  ;;  %3197 = vmatpush3.msra.mxu1 %v818_v36 }
 0x3b3   : > { %v2043_v47 = vadd.f32 %v2040_v39, %v1942_v38  ;;  %3198 = vmatprep.subr.mxu1 %v3329_v7 }
 0x3b4   : > { %v1933_v45 = vpop.f32.mrf.mxu0  ;;  %v2031_v49 = vpop.f32.mrf.mxu1 }
 0x3b5   : > { %2046 = vst.msk [vmem:[#allocation3 + $0x11] sm:$0xff] %vm839_vm2, %v2043_v47  ;;  %v1943_v50 = vmul.f32 %v1933_v45, %v3862_v4  ;;  %v2041_v51 = vmul.f32 %v2031_v49, %v3866_v10  ;;  %v2855_v4 = vld [vmem:[%s4146_s25] ss:$0 sm:$0xff] }
 0x3b6   : > { %v3154_v52 = vpop.f32.mrf.mxu0  ;;  %v3165_v53 = vpop.f32.mrf.mxu1 }
 0x3b7   : > { %v2044_v54 = vadd.f32 %v2041_v51, %v1943_v50 }
 0x3b8   : > { %v1938_v55 = vpop.f32.mrf.mxu0  ;;  %v2036_v26 = vpop.f32.mrf.mxu1 }
 0x3b9   : > { %2047 = vst.msk [vmem:[#allocation3 + $0x19] sm:$0xff] %vm839_vm2, %v2044_v54  ;;  %v1944_v60 = vmul.f32 %v1938_v55, %v3850_v44  ;;  %v2042_v63 = vmul.f32 %v2036_v26, %v3855_v9 }
 0x3ba   : > { %v3157_v56 = vpop.f32.mrf.mxu0  ;;  %v3168_v27 = vpop.f32.mrf.mxu1 }
 0x3bb   : > { %v2045_v29 = vadd.f32 %v2042_v63, %v1944_v60 }
 0x3bc   : > { %v2141_v10 = vpop.f32.mrf.mxu0  ;;  %v2051_v31 = vld [vmem:[#allocation3 + $0x10] sm:$0xff] }
 0x3bd   : > { %2048 = vst.msk [vmem:[#allocation3 + $0x21] sm:$0x1] %vm1615_vm6, %v2045_v29  ;;  %v2142_v32 = vadd.f32 %v2855_v4, %v2141_v10  ;;  %3184 = vmatmul.mubr.msk.f32.gmra.mxu0 %vm839_vm2, %v2051_v31  ;;  %v2861_v31 = vld [vmem:[%s4147_s1] ss:$0 sm:$0xff] }
 0x3be   : > { %v3179_v20 = vpop.f32.mrf.mxu0  ;;  %3186 = vmatprep.mubr.msk.f32.mxu0 %vm3330_vm3, %v3329_v7 }
 0x3bf   : > { %v2165_v44 = vadd.f32 %v2142_v32, %v3545_v15  ;;  %v2862_v20 = vld [vmem:[%s4148_s0] ss:$0 sm:$0xff] }
 0x3c0   : > { %v2146_v9 = vpop.f32.mrf.mxu0  ;;  %v2052_v41 = vld [vmem:[#allocation3 + $0x18] sm:$0xff] }
 0x3c1   : > { %v2147_v42 = vadd.f32 %v2855_v4, %v2146_v9  ;;  %3187 = vmatmul.mubr.msk.f32.gmra.mxu0 %vm839_vm2, %v2052_v41  ;;  %v2170_v23 = vsel %vm839_vm2, %v2165_v44, 0.0 }
 0x3c2   : > { %2171 = vadd.xlane.f32.xlu0 %v2170_v23  ;;  %v3182_v48 = vpop.f32.mrf.mxu0  ;;  %3189 = vmatprep.mubr.msk.f32.mxu0 %vm3330_vm3, %v3329_v7 }
 0x3c3   : > { %v2166_v34 = vadd.f32 %v2147_v42, %v3563_v22 }
 0x3c4   : > { %v2053_v46 = vld [vmem:[#allocation3 + $0x20] sm:$0x3] }
 0x3c5   : > { %3190 = vmatmul.mubr.msk.f32.gmra.mxu0 %vm839_vm2, %v2053_v46  ;;  %v2173_v57 = vsel %vm839_vm2, %v2166_v34, 0.0  ;;  %v828_v46 = vld [vmem:[%s3494_s3 + $0x30] sm:$0xff] }
 0x3c6   : > { %2174 = vadd.xlane.f32.xlu0 %v2173_v57  ;;  %3231 = vmatprep.mubr.msk.f32.mxu0 %vm3330_vm3, %v3329_v7  ;;  %v827_v57 = vld [vmem:[%s3494_s3 + $0x28] sm:$0xff] }
 0x44b   : > { %v2172_v15 = vpop.xlane.xlu0 %2171 }
 0x44c   : > { %v2187_v58 = vmul.f32 0.03125, %v2172_v15  ;;  %v826_v15 = vld [vmem:[%s3494_s3 + $0x20] sm:$0xff] }
 0x44e   : > { %v2192_v2 = vsub.f32 %v2165_v44, %v2187_v58  ;;  %v824_v58 = vld [vmem:[%s3494_s3 + $0x10] sm:$0xff] }
 0x44f   : > { %v2175_v61 = vpop.xlane.xlu0 %2174 }
 0x450   : > { %v2188_v22 = vmul.f32 0.03125, %v2175_v61  ;;  %v2197_v18 = vmul.f32 %v2192_v2, %v2192_v2  ;;  %v822_v61 = vld [vmem:[%s3494_s3] sm:$0xff] }
 0x452   : > { %v2193_v13 = vsub.f32 %v2166_v34, %v2188_v22  ;;  %v2202_v24 = vsel %vm839_vm2, %v2197_v18, 0.0  ;;  %v829_v34 = vld [vmem:[%s3494_s3 + $0x38] sm:$0xff] }
 0x453   : > { %3216 = vmatpush3.msra.mxu0 %v829_v34 }
 0x454   : > { %3217 = vmatprep.subr.mxu0 %v3329_v7 }
 0x455   : > { %3218 = vmatpush3.msra.mxu0 %v828_v46 }
 0x456   : > { %3219 = vmatprep.subr.mxu0 %v3329_v7 }
 0x457   : > { %3220 = vmatpush3.msra.mxu0 %v827_v57 }
 0x458   : > { %3221 = vmatprep.subr.mxu0 %v3329_v7 }
 0x459   : > { %3222 = vmatpush3.msra.mxu0 %v826_v15 }
 0x45a   : > { %3223 = vmatprep.subr.mxu0 %v3329_v7 }
 0x47d   : > { %v2151_v12 = vpop.f32.mrf.mxu0 }
 0x47e   : > { %v2152_v59 = vadd.f32 %v2855_v4, %v2151_v12  ;;  %v825_v12 = vld [vmem:[%s3494_s3 + $0x18] sm:$0xff] }
 0x47f   : > { %v3185_v62 = vpop.f32.mrf.mxu0  ;;  %3224 = vmatpush3.msra.mxu0 %v825_v12 }
 0x480   : > { %v2167_v0 = vadd.f32 %v2152_v59, %v3577_v25  ;;  %3225 = vmatprep.subr.mxu0 %v3329_v7  ;;  %v823_v59 = vld [vmem:[%s3494_s3 + $0x8] sm:$0xff] }
 0x481   : > { %v2156_v1 = vpop.f32.mrf.mxu0  ;;  %3226 = vmatpush3.msra.mxu0 %v824_v58 }
 0x482   : > { %v2157_v3 = vadd.f32 %v2855_v4, %v2156_v1  ;;  %v2176_v5 = vsel %vm839_vm2, %v2167_v0, 0.0  ;;  %3227 = vmatprep.subr.mxu0 %v3329_v7 }
 0x483   : > { %2177 = vadd.xlane.f32.xlu1 %v2176_v5  ;;  %v3188_v6 = vpop.f32.mrf.mxu0  ;;  %3228 = vmatpush3.msra.mxu0 %v823_v59 }
 0x484   : > { %v2168_v8 = vadd.f32 %v2157_v3, %v3541_v14  ;;  %v2198_v14 = vmul.f32 %v2193_v13, %v2193_v13  ;;  %3229 = vmatprep.subr.mxu0 %v3329_v7 }
 0x485   : > { %v2161_v11 = vpop.f32.mrf.mxu0  ;;  %3230 = vmatpush3.msra.mxu0 %v822_v61 }
 0x486   : > { %v2162_v16 = vadd.f32 %v2855_v4, %v2161_v11  ;;  %v2179_v17 = vsel %vm839_vm2, %v2168_v8, 0.0  ;;  %v2205_v30 = vsel %vm839_vm2, %v2198_v14, 0.0 }
 0x487   : > { %2180 = vadd.xlane.f32.xlu1 %v2179_v17  ;;  %v3191_v25 = vpop.f32.mrf.mxu0 }
 0x488   : > { %v2169_v19 = vadd.f32 %v2162_v16, %v3558_v21  ;;  %v817_v21 = vld [vmem:[%s3484_s29] sm:$0xff] }
 0x489   : > { %3199 = vmatpush3.msra.mxu1 %v817_v21 }
 0x48a   : > { %v2183_v28 = vsel %vm2182_vm9, %v2169_v19, 0.0 }
 0x48b   : > { %2203 = vadd.xlane.f32.xlu1 %v2202_v24  ;;  %2184 = vadd.xlane.f32.xlu0 %v2183_v28 }
 0x48f   : > { %2206 = vadd.xlane.f32.xlu0 %v2205_v30 }
 0x50c   : > { %v2178_v37 = vpop.xlane.xlu1 %2177 }
 0x50d   : > { %v2189_v38 = vmul.f32 0.03125, %v2178_v37 }
 0x50f   : > { %v3949_v39 = vsub.f32 %v2167_v0, %v2189_v38 }
 0x510   : > { %v2181_v40 = vpop.xlane.xlu1 %2180 }
 0x511   : > { %v2190_v43 = vmul.f32 0.03125, %v2181_v40  ;;  %v2199_v47 = vmul.f32 %v3949_v39, %v3949_v39 }
 0x513   : > { %v3953_v45 = vsub.f32 %v2168_v8, %v2190_v43  ;;  %v2208_v49 = vsel %vm839_vm2, %v2199_v47, 0.0 }
 0x514   : > { %2209 = vadd.xlane.f32.xlu1 %v2208_v49  ;;  %v2204_v50 = vpop.xlane.xlu1 %2203  ;;  %v2185_v51 = vpop.xlane.xlu0 %2184 }
 0x515   : > { %v2217_v52 = vmul.f32 0.03125, %v2204_v50  ;;  %v2191_v53 = vmul.f32 0.03125, %v2185_v51  ;;  %v2200_v54 = vmul.f32 %v3953_v45, %v3953_v45 }
 0x517   : > { %v2222_v55 = vadd.f32 1e-05, %v2217_v52  ;;  %v3958_v26 = vsub.f32 %v2169_v19, %v2191_v53  ;;  %v2211_v60 = vsel %vm839_vm2, %v2200_v54, 0.0 }
 0x518   : > { %2212 = vadd.xlane.f32.xlu0 %v2211_v60  ;;  %v2207_v63 = vpop.xlane.xlu0 %2206 }
 0x519   : > { %3301 = vrsqrt.f32 %v2222_v55  ;;  %v2218_v56 = vmul.f32 0.03125, %v2207_v63  ;;  %v2201_v27 = vmul.f32 %v3958_v26, %v3958_v26 }
 0x51b   : > { %v2223_v4 = vadd.f32 1e-05, %v2218_v56  ;;  %v2214_v29 = vsel %vm2182_vm9, %v2201_v27, 0.0  ;;  %v2869_v27 = vld [vmem:[%s767_s16] ss:$0 sm:$0xff] }
 0x51c   : > { %2215 = vadd.xlane.f32.xlu1 %v2214_v29 }
 0x51d   : > { %3303 = vrsqrt.f32 %v2223_v4 }
 0x526   : > { %v3302_v10 = vpop.eup %3301 }
 0x527   : > { %v2232_v32 = vmul.f32 %v3302_v10, %v2192_v2 }
 0x529   : > { %v2243_v44 = vmul.f32 %v2861_v31, %v2232_v32 }
 0x52a   : > { %v3304_v9 = vpop.eup %3303 }
 0x52b   : > { %v3974_v41 = vadd.f32 %v2862_v20, %v2243_v44  ;;  %v2233_v42 = vmul.f32 %v3304_v9, %v2193_v13 }
 0x52d   : > { %3201 = vmatmul.mubr.msk.f32.vlgmr.msra.gmra.mxu1 %vm839_vm2, %v3974_v41  ;;  %v2244_v23 = vmul.f32 %v2861_v31, %v2233_v42 }
 0x52e   : > { %3203 = vmatprep.mubr.msk.f32.mxu1 %vm3330_vm3, %v3329_v7 }
 0x52f   : > { %v3980_v48 = vadd.f32 %v2862_v20, %v2244_v23 }
 0x531   : > { %3204 = vmatmul.mubr.msk.f32.gmra.mxu1 %vm839_vm2, %v3980_v48 }
 0x532   : > { %3206 = vmatprep.mubr.msk.f32.mxu1 %vm3330_vm3, %v3329_v7 }
 0x59d   : > { %v2210_v62 = vpop.xlane.xlu1 %2209 }
 0x59e   : > { %v2219_v0 = vmul.f32 0.03125, %v2210_v62 }
 0x5a0   : > { %v2224_v1 = vadd.f32 1e-05, %v2219_v0 }
 0x5a1   : > { %v2213_v2 = vpop.xlane.xlu0 %2212 }
 0x5a2   : > { %3305 = vrsqrt.f32 %v2224_v1  ;;  %v2220_v22 = vmul.f32 0.03125, %v2213_v2 }
 0x5a4   : > { %v2225_v3 = vadd.f32 1e-05, %v2220_v22 }
 0x5a5   : > { %v2216_v5 = vpop.xlane.xlu1 %2215 }
 0x5a6   : > { %3307 = vrsqrt.f32 %v2225_v3  ;;  %v2221_v6 = vmul.f32 0.03125, %v2216_v5 }
 0x5a8   : > { %v2226_v8 = vadd.f32 1e-05, %v2221_v6 }
 0x5aa   : > { %3309 = vrsqrt.f32 %v2226_v8 }
 0x5af   : > { %v3306_v11 = vpop.eup %3305 }
 0x5b0   : > { %v2234_v13 = vmul.f32 %v3306_v11, %v3949_v39 }
 0x5b2   : > { %v2245_v16 = vmul.f32 %v2861_v31, %v2234_v13 }
 0x5b3   : > { %v3308_v17 = vpop.eup %3307 }
 0x5b4   : > { %v2256_v18 = vadd.f32 %v2862_v20, %v2245_v16  ;;  %v2235_v25 = vmul.f32 %v3308_v17, %v3953_v45 }
 0x5b6   : > { %3207 = vmatmul.mubr.msk.f32.gmra.mxu1 %vm839_vm2, %v2256_v18  ;;  %v2246_v19 = vmul.f32 %v2861_v31, %v2235_v25 }
 0x5b7   : > { %v3310_v24 = vpop.eup %3309  ;;  %3209 = vmatprep.mubr.msk.f32.mxu1 %vm3330_vm3, %v3329_v7 }
 0x5b8   : > { %v2257_v28 = vadd.f32 %v2862_v20, %v2246_v19  ;;  %v2236_v14 = vmul.f32 %v3310_v24, %v3958_v26 }
 0x5ba   : > { %3210 = vmatmul.mubr.msk.f32.gmra.mxu1 %vm839_vm2, %v2257_v28  ;;  %v2247_v30 = vmul.f32 %v2861_v31, %v2236_v14 }
 0x5bb   : > { %3212 = vmatprep.mubr.msk.f32.mxu1 %vm3330_vm3, %v3329_v7 }
 0x5bc   : > { %v4010_v33 = vadd.f32 %v2862_v20, %v2247_v30 }
 0x5be   : > { %3213 = vmatmul.mubr.msk.f32.gmra.mxu1 %vm839_vm2, %v4010_v33 }
 0x5ed   : > { %v2346_v36 = vpop.f32.mrf.mxu1 }
 0x5ee   : > { %v2347_v21 = vadd.f32 %v2863_v35, %v2346_v36 }
 0x5ef   : > { %v3202_v37 = vpop.f32.mrf.mxu1 }
 0x5f0   : > { %v2370_v38 = vmax.f32 %v2347_v21, 0.0 }
 0x5f1   : > { %v2351_v39 = vpop.f32.mrf.mxu1 }
 0x5f2   : > { %v2352_v40 = vadd.f32 %v2863_v35, %v2351_v39  ;;  %3232 = vmatmul.mubr.msk.f32.vlgmr.msra.gmra.mxu0 %vm2381_vm11, %v2370_v38 }
 0x5f3   : > { %v3205_v43 = vpop.f32.mrf.mxu1  ;;  %3234 = vmatprep.mubr.msk.f32.mxu0 %vm3330_vm3, %v3329_v7 }
 0x5f4   : > { %v2371_v47 = vmax.f32 %v2352_v40, 0.0 }
 0x5f6   : > { %3235 = vmatmul.mubr.msk.f32.gmra.mxu0 %vm2381_vm11, %v2371_v47 }
 0x5f7   : > { %3237 = vmatprep.mubr.msk.f32.mxu0 %vm3330_vm3, %v3329_v7 }
 0x676   : > { %v2356_v45 = vpop.f32.mrf.mxu1 }
 0x677   : > { %v2357_v49 = vadd.f32 %v2863_v35, %v2356_v45 }
 0x678   : > { %v3208_v50 = vpop.f32.mrf.mxu1 }
 0x679   : > { %v2372_v51 = vmax.f32 %v2357_v49, 0.0 }
 0x67a   : > { %v2361_v52 = vpop.f32.mrf.mxu1 }
 0x67b   : > { %v2362_v53 = vadd.f32 %v2863_v35, %v2361_v52  ;;  %3238 = vmatmul.mubr.msk.f32.gmra.mxu0 %vm2381_vm11, %v2372_v51 }
 0x67c   : > { %v3211_v54 = vpop.f32.mrf.mxu1  ;;  %3240 = vmatprep.mubr.msk.f32.mxu0 %vm3330_vm3, %v3329_v7 }
 0x67d   : > { %v2373_v55 = vmax.f32 %v2362_v53, 0.0  ;;  %v2875_v54 = vld [vmem:[%s770_s28] ss:$0 sm:$0xff] }
 0x67e   : > { %v2366_v26 = vpop.f32.mrf.mxu1 }
 0x67f   : > { %v2367_v60 = vadd.f32 %v2863_v35, %v2366_v26  ;;  %3241 = vmatmul.mubr.msk.f32.gmra.mxu0 %vm2381_vm11, %v2373_v55  ;;  %v2876_v26 = vld [vmem:[%s773_s11] ss:$0 sm:$0xff]  ;;  %s4151_s11 = sld [smem:[#allocation5_spill]] }
 0x680   : > { %v3214_v63 = vpop.f32.mrf.mxu1  ;;  %3243 = vmatprep.mubr.msk.f32.mxu0 %vm3330_vm3, %v3329_v7 }
 0x681   : > { %v2374_v56 = vmax.f32 %v2367_v60, 0.0 }
 0x683   : > { %3244 = vmatmul.mubr.msk.f32.gmra.mxu0 %vm2381_vm11, %v2374_v56 }
 0x685   : > { %p2877_p5 = scmp.ne.s32.totalorder %s4151_s11, 1 }
 0x686   : > { %s4152_s17 = sld [smem:[#allocation15_spill]] (!%p2877_p5) }
 0x6b2   : > { %v2463_v4 = vpop.f32.mrf.mxu0 }
 0x6b3   : > { %v2464_v29 = vadd.f32 %v2869_v27, %v2463_v4 }
 0x6b4   : > { %v3233_v10 = vpop.f32.mrf.mxu0 }
 0x6b5   : > { %v2487_v31 = vadd.f32 %v2464_v29, %v3974_v41 }
 0x6b6   : > { %v2468_v32 = vpop.f32.mrf.mxu0 }
 0x6b7   : > { %v2469_v20 = vadd.f32 %v2869_v27, %v2468_v32  ;;  %v2492_v44 = vsel %vm839_vm2, %v2487_v31, 0.0 }
 0x6b8   : > { %2493 = vadd.xlane.f32.xlu0 %v2492_v44  ;;  %v3236_v9 = vpop.f32.mrf.mxu0 }
 0x6b9   : > { %v2488_v7 = vadd.f32 %v2469_v20, %v3980_v48 }
 0x6bb   : > { %v2495_v42 = vsel %vm839_vm2, %v2488_v7, 0.0 }
 0x6bc   : > { %2496 = vadd.xlane.f32.xlu1 %v2495_v42 }
 0x73b   : > { %v2473_v23 = vpop.f32.mrf.mxu0 }
 0x73c   : > { %v2474_v34 = vadd.f32 %v2869_v27, %v2473_v23 }
 0x73d   : > { %v3239_v46 = vpop.f32.mrf.mxu0 }
 0x73e   : > { %v2489_v57 = vadd.f32 %v2474_v34, %v2256_v18 }
 0x73f   : > { %v2478_v15 = vpop.f32.mrf.mxu0 }
 0x740   : > { %v2479_v12 = vadd.f32 %v2869_v27, %v2478_v15  ;;  %v2498_v58 = vsel %vm839_vm2, %v2489_v57, 0.0 }
 0x741   : > { %v2494_v41 = vpop.xlane.xlu0 %2493  ;;  %2499 = vadd.xlane.f32.xlu0 %v2498_v58  ;;  %v3242_v59 = vpop.f32.mrf.mxu0 }
 0x742   : > { %v2507_v61 = vmul.f32 0.03125, %v2494_v41  ;;  %v2490_v62 = vadd.f32 %v2479_v12, %v2257_v28 }
 0x743   : > { %v2483_v0 = vpop.f32.mrf.mxu0 }
 0x744   : > { %v2512_v1 = vsub.f32 %v2487_v31, %v2507_v61  ;;  %v2484_v2 = vadd.f32 %v2869_v27, %v2483_v0  ;;  %v2501_v48 = vsel %vm839_vm2, %v2490_v62, 0.0 }
 0x745   : > { %v2497_v22 = vpop.xlane.xlu1 %2496  ;;  %2502 = vadd.xlane.f32.xlu1 %v2501_v48  ;;  %v3245_v3 = vpop.f32.mrf.mxu0 }
 0x746   : > { %v2508_v5 = vmul.f32 0.03125, %v2497_v22  ;;  %v2517_v6 = vmul.f32 %v2512_v1, %v2512_v1  ;;  %v2491_v8 = vadd.f32 %v2484_v2, %v4010_v33 }
 0x748   : > { %v2513_v11 = vsub.f32 %v2488_v7, %v2508_v5  ;;  %v2522_v13 = vsel %vm839_vm2, %v2517_v6, 0.0  ;;  %v2504_v16 = vsel %vm2182_vm9, %v2491_v8, 0.0 }
 0x749   : > { %2523 = vadd.xlane.f32.xlu1 %v2522_v13  ;;  %2505 = vadd.xlane.f32.xlu0 %v2504_v16 }
 0x74a   : > { %v2518_v17 = vmul.f32 %v2513_v11, %v2513_v11 }
 0x74c   : > { %v2525_v18 = vsel %vm839_vm2, %v2518_v17, 0.0 }
 0x74d   : > { %2526 = vadd.xlane.f32.xlu0 %v2525_v18 }
 0x7ca   : > { %v2500_v25 = vpop.xlane.xlu0 %2499 }
 0x7cb   : > { %v2509_v19 = vmul.f32 0.03125, %v2500_v25 }
 0x7cd   : > { %v2514_v24 = vsub.f32 %v2489_v57, %v2509_v19 }
 0x7ce   : > { %v2503_v28 = vpop.xlane.xlu1 %2502 }
 0x7cf   : > { %v2510_v14 = vmul.f32 0.03125, %v2503_v28  ;;  %v2519_v30 = vmul.f32 %v2514_v24, %v2514_v24 }
 0x7d1   : > { %v2515_v35 = vsub.f32 %v2490_v62, %v2510_v14  ;;  %v2528_v33 = vsel %vm839_vm2, %v2519_v30, 0.0 }
 0x7d2   : > { %2529 = vadd.xlane.f32.xlu1 %v2528_v33  ;;  %v2524_v36 = vpop.xlane.xlu1 %2523  ;;  %v2506_v21 = vpop.xlane.xlu0 %2505 }
 0x7d3   : > { %v2537_v37 = vmul.f32 0.03125, %v2524_v36  ;;  %v2511_v38 = vmul.f32 0.03125, %v2506_v21  ;;  %v2520_v39 = vmul.f32 %v2515_v35, %v2515_v35 }
 0x7d5   : > { %v2542_v40 = vadd.f32 1e-05, %v2537_v37  ;;  %v2516_v43 = vsub.f32 %v2491_v8, %v2511_v38  ;;  %v2531_v47 = vsel %vm839_vm2, %v2520_v39, 0.0 }
 0x7d6   : > { %2532 = vadd.xlane.f32.xlu0 %v2531_v47  ;;  %v2527_v45 = vpop.xlane.xlu0 %2526 }
 0x7d7   : > { %3311 = vrsqrt.f32 %v2542_v40  ;;  %v2538_v49 = vmul.f32 0.03125, %v2527_v45  ;;  %v2521_v50 = vmul.f32 %v2516_v43, %v2516_v43 }
 0x7d9   : > { %v2543_v51 = vadd.f32 1e-05, %v2538_v49  ;;  %v2534_v52 = vsel %vm2182_vm9, %v2521_v50, 0.0 }
 0x7da   : > { %2535 = vadd.xlane.f32.xlu1 %v2534_v52 }
 0x7db   : > { %3313 = vrsqrt.f32 %v2543_v51 }
 0x7e4   : > { %v3312_v53 = vpop.eup %3311 }
 0x7e5   : > { %v2552_v55 = vmul.f32 %v3312_v53, %v2512_v1 }
 0x7e7   : > { %v2563_v60 = vmul.f32 %v2875_v54, %v2552_v55 }
 0x7e8   : > { %v3314_v63 = vpop.eup %3313 }
 0x7e9   : > { %v2574_v56 = vadd.f32 %v2876_v26, %v2563_v60  ;;  %v2553_v27 = vmul.f32 %v3314_v63, %v2513_v11 }
 0x7eb   : > { %2579 = vst.msk [vmem:[#allocation2] sm:$0xff] %vm839_vm2, %v2574_v56  ;;  %v2564_v4 = vmul.f32 %v2875_v54, %v2553_v27 }
 0x7ed   : > { %v2575_v29 = vadd.f32 %v2876_v26, %v2564_v4 }
 0x7ef   : > { %2580 = vst.msk [vmem:[#allocation2 + $0x8] sm:$0xff] %vm839_vm2, %v2575_v29 }
 0x85b   : > { %v2530_v10 = vpop.xlane.xlu1 %2529 }
 0x85c   : > { %v2539_v31 = vmul.f32 0.03125, %v2530_v10 }
 0x85e   : > { %v2544_v32 = vadd.f32 1e-05, %v2539_v31 }
 0x85f   : > { %v2533_v20 = vpop.xlane.xlu0 %2532 }
 0x860   : > { %3315 = vrsqrt.f32 %v2544_v32  ;;  %v2540_v44 = vmul.f32 0.03125, %v2533_v20 }
 0x862   : > { %v2545_v9 = vadd.f32 1e-05, %v2540_v44 }
 0x863   : > { %v2536_v7 = vpop.xlane.xlu1 %2535 }
 0x864   : > { %3317 = vrsqrt.f32 %v2545_v9  ;;  %v2541_v42 = vmul.f32 0.03125, %v2536_v7 }
 0x866   : > { %v2546_v23 = vadd.f32 1e-05, %v2541_v42 }
 0x868   : > { %3319 = vrsqrt.f32 %v2546_v23 }
 0x86d   : > { %v3316_v34 = vpop.eup %3315 }
 0x86e   : > { %v2554_v46 = vmul.f32 %v3316_v34, %v2514_v24 }
 0x870   : > { %v2565_v57 = vmul.f32 %v2875_v54, %v2554_v46 }
 0x871   : > { %v3318_v15 = vpop.eup %3317 }
 0x872   : > { %v2576_v12 = vadd.f32 %v2876_v26, %v2565_v57  ;;  %v2555_v58 = vmul.f32 %v3318_v15, %v2515_v35 }
 0x874   : > { %2581 = vst.msk [vmem:[#allocation2 + $0x10] sm:$0xff] %vm839_vm2, %v2576_v12  ;;  %v2566_v41 = vmul.f32 %v2875_v54, %v2555_v58 }
 0x875   : > { %v3320_v59 = vpop.eup %3319 }
 0x876   : > { %v2577_v61 = vadd.f32 %v2876_v26, %v2566_v41  ;;  %v2556_v62 = vmul.f32 %v3320_v59, %v2516_v43 }
 0x878   : > { %2582 = vst.msk [vmem:[#allocation2 + $0x18] sm:$0xff] %vm839_vm2, %v2577_v61  ;;  %v2567_v0 = vmul.f32 %v2875_v54, %v2556_v62  ;;  %2587 = sbr.rel (%p2877_p5) target bundleno = 2181 (0x885), region = 96 }
 0x87a   : > { %v2578_v1 = vadd.f32 %v2876_v26, %v2567_v0 }
 0x87c   : > { %2583 = vst.msk [vmem:[#allocation2 + $0x20] sm:$0x3] %vm2182_vm9, %v2578_v1 }
 0x87d   : > { %v2588_v2 = vld [vmem:[#allocation2] sm:$0xff]  ;;  %v2589_v48 = vld [vmem:[#allocation2 + $0x8] sm:$0xff]  ;;  %v2590_v22 = vld [vmem:[#allocation2 + $0x10] sm:$0xff] }
 0x87e   : > { %2593 = vst.msk [vmem:[%s4152_s17] sm:$0xff] %vm839_vm2, %v2588_v2  ;;  %2594 = vst.msk [vmem:[%s4152_s17 + $0x8] sm:$0xff] %vm839_vm2, %v2589_v48 }
 0x87f   : > { %2595 = vst.msk [vmem:[%s4152_s17 + $0x10] sm:$0xff] %vm839_vm2, %v2590_v22  ;;  %v2591_v3 = vld [vmem:[#allocation2 + $0x18] sm:$0xff] }
 0x880   : > { %2596 = vst.msk [vmem:[%s4152_s17 + $0x18] sm:$0xff] %vm839_vm2, %v2591_v3 }
 0x883   : > { %v2592_v5 = vld [vmem:[#allocation2 + $0x20] sm:$0x3] }
 0x884   : > { %2597 = vst.msk [vmem:[%s4152_s17 + $0x20] sm:$0x3] %vm2182_vm9, %v2592_v5 }
 0x885 PF: > { %s4153_s18 = sld [smem:[#allocation4_spill]] }
 0x88b   : > { %s27_s24 = sadd.s32 1, %s4153_s18  }
 0x88c   : > { %p24_p6 = scmp.ge.s32.totalorder %s27_s24, 4  }
 0x88e   :  { %26 = sbr.rel (!%p24_p6) target bundleno = 10 (0xa), region = 167 }

</bundles_post_ra>
